<compile_context>
chip_gen: v5e
topology: v5e:2x2
jax: 0.10.0
libtpu: 0.0.40
codegen_flags: <defaults>
</compile_context>

<pallas_src>
import functools

import jax
import jax.numpy as jnp
import numpy as np
from jax.experimental import pallas as pl


# ----------------------------------------------------------------------------
# Fused kernel: embedding -> 2 x bidirectional LSTM layers -> fc
# ----------------------------------------------------------------------------
def _bilstm2_fc_kernel(ids2_ref, slab0_ref, slab1_ref, fc_ref, out_ref):
    """Whole forward pass of the PyTorch `RNN` module (eval mode).

    ids2_ref : (seq*Bp, 2) int32  time-major rows (row = t*Bp + b);
                                  col0 = token id at position t,
                                  col1 = Vp + token id at position seq-1-t
    slab0_ref: (2*Vp + 2H, 8H)    rows [0:2Vp)  per-token layer-0 input gates
                                  (emb @ W_ih^T + b), fwd rows then bwd rows,
                                  gate-major columns [i_f,i_b,f_f,f_b,g_f,g_b,o_f,o_b];
                                  rows [2Vp:)   block-diag W_hh (fwd rows | bwd rows)
    slab1_ref: (4H + 8 + 2H, 8H)  rows [0:4H)   layer-1 input selection weights,
                                  row 4H        combined bias,
                                  rows [4H+8:)  block-diag W_hh
    fc_ref   : (8, 2H)            row 0 = fc weight ([fwd|bwd]), [1,0] = fc bias
    out_ref  : (Bp, 1)            fc output (padded batch)
    """
    f32 = jnp.float32
    bp = out_ref.shape[0]
    sb = ids2_ref.shape[0]
    seq = sb // bp
    H = slab0_ref.shape[1] // 8
    H2 = 2 * H
    Vp2 = slab0_ref.shape[0] - H2          # = 2 * padded vocab

    # ---- hoisted layer-0 input gates: ONE combined (fwd + bwd) one-hot matmul.
    # Biases are pre-folded into the table rows, so selecting a row adds them.
    # TODO(synk): nn.Dropout on the embedding / hidden is identity (eval mode).
    # TODO(synk): for realistic vocab sizes keep the table in HBM and DMA-gather
    #             rows instead of the all-in-VMEM one-hot matmul.
    iota = jax.lax.broadcasted_iota(jnp.int32, (sb, Vp2), 1)
    onehot = ((iota == ids2_ref[:, 0:1]) | (iota == ids2_ref[:, 1:2])).astype(f32)
    gx0 = jnp.dot(onehot, slab0_ref[0:Vp2, :], preferred_element_type=f32)   # (sb, 8H)

    # resident weights, loaded once (outside the recurrence)
    whh0 = slab0_ref[Vp2:Vp2 + H2, :]                    # (2H, 8H)
    wih1 = slab1_ref[0:4 * H, :]                         # (4H, 8H)
    b1 = slab1_ref[4 * H:4 * H + 1, :]                   # (1, 8H)
    whh1 = slab1_ref[4 * H + 8:4 * H + 8 + H2, :]        # (2H, 8H)

    def run_layer(gx, whh, collect):
        """Fused fwd+bwd recurrence.  h/c are (Bp, 2H) = [fwd | bwd]; gates are
        (Bp, 8H) gate-major so ONE block-diagonal matmul feeds both directions.
        At iteration t the fwd half processes position t and the bwd half
        position seq-1-t.  seq is small & static -> keep the loop fully
        unrolled so the carries stay in vregs (switch to lax.fori_loop if
        seq grows beyond ~32)."""
        h = jnp.zeros((bp, H2), f32)
        c = jnp.zeros((bp, H2), f32)
        hs = []
        for t in range(seq):
            gates = gx[t * bp:(t + 1) * bp, :] + jnp.dot(
                h, whh, preferred_element_type=f32)
            sg = jax.nn.sigmoid(gates)        # one full-width pass
            tg = jnp.tanh(gates)              # one full-width pass
            #         f                    c         i               g
            c = sg[:, H2:2 * H2] * c + sg[:, 0:H2] * tg[:, 2 * H2:3 * H2]
            #        o
            h = sg[:, 3 * H2:4 * H2] * jnp.tanh(c)
            if collect:
                hs.append(h)
        return h, hs

    # ---- layer 0 ----
    _, hs0 = run_layer(gx0, whh0, collect=True)

    # ---- layer 1: hoist the input projection for all steps & both directions.
    # Per-step layer-1 input row slab t is
    #   [out_f(t) | out_b(seq-1-t) | out_f(seq-1-t) | out_b(t)]  (Bp, 4H)
    # built from full (Bp, 2H) carries only (no sub-lane slicing); the position
    # selection lives in the zero blocks of wih1.
    x1 = jnp.concatenate(
        [jnp.concatenate([hs0[t], hs0[seq - 1 - t]], axis=1) for t in range(seq)],
        axis=0)                                                       # (sb, 4H)
    gx1 = jnp.dot(x1, wih1, preferred_element_type=f32) + b1          # (sb, 8H)
    h1, _ = run_layer(gx1, whh1, collect=False)

    # ---- fc head on concat(hidden[-2], hidden[-1]) = h1 directly; dropout is
    #      identity.  VPU multiply + lane reduce (skip an N=1 MXU pass).
    out = jnp.sum(h1 * fc_ref[0:1, :], axis=1, keepdims=True) + fc_ref[1:2, 0:1]
    out_ref[...] = out.astype(out_ref.dtype)


# ----------------------------------------------------------------------------
# Wrapper (mirrors the PyTorch RNN.forward, eval mode)
# ----------------------------------------------------------------------------
@functools.partial(jax.jit, static_argnums=2)
def rnn_forward(x_idx, params, hidden_dim):
    f32 = jnp.float32
    S, B = x_idx.shape
    H = hidden_dim
    H2, H4 = 2 * H, 4 * H
    Bp = max(((B + 7) // 8) * 8, 8)          # pad batch to a sublane multiple
    V, _ = params["embedding"].shape
    Vp = ((V + 7) // 8) * 8                  # pad vocab rows to a sublane multiple

    def gate_major(g4, which):
        """(..., 4H) with [i|f|g|o] columns -> (..., 8H) gate-major interleaved
        [i_f,i_b,f_f,f_b,g_f,g_b,o_f,o_b], filling only direction `which`."""
        z = jnp.zeros(g4.shape[:-1] + (H,), f32)
        parts = []
        for g in range(4):
            blk = g4[..., g * H:(g + 1) * H]
            parts += ([blk, z] if which == "f" else [z, blk])
        return jnp.concatenate(parts, axis=-1)

    def whh_bd(layer):
        """Block-diagonal recurrent weight (2H, 8H): rows 0:H act on h_fwd,
        rows H:2H act on h_bwd; columns are gate-major interleaved."""
        wf = params[f"w_hh_l{layer}"].T.astype(f32)        # (H, 4H)
        wb = params[f"w_hh_l{layer}_r"].T.astype(f32)
        return jnp.concatenate([gate_major(wf, "f"), gate_major(wb, "b")], axis=0)

    # ---- layer 0: fold embedding @ W_ih^T + (b_ih + b_hh) into one gather table
    emb = params["embedding"].astype(f32)
    pf = gate_major(emb @ params["w_ih_l0"].T
                    + (params["b_ih_l0"] + params["b_hh_l0"]), "f")     # (V, 8H)
    pb = gate_major(emb @ params["w_ih_l0_r"].T
                    + (params["b_ih_l0_r"] + params["b_hh_l0_r"]), "b")  # (V, 8H)
    pf = jnp.pad(pf, ((0, Vp - V), (0, 0)))
    pb = jnp.pad(pb, ((0, Vp - V), (0, 0)))
    slab0 = jnp.concatenate([pf, pb, whh_bd(0)], axis=0)       # (2Vp + 2H, 8H)

    # ---- layer 1: input-selection weights for the fused fwd/bwd loop.
    # Kernel-side layer-1 input per step = [out_f(t) | out_b(s-1-t) | out_f(s-1-t) | out_b(t)]
    w1f = params["w_ih_l1"].T.astype(f32)      # (2H, 4H): rows = [fwd_l0 | bwd_l0] features
    w1b = params["w_ih_l1_r"].T.astype(f32)
    zH4 = jnp.zeros((H, H4), f32)
    sel_f = jnp.concatenate([w1f[0:H], zH4, zH4, w1f[H:H2]], axis=0)   # -> fwd gates
    sel_b = jnp.concatenate([zH4, w1b[H:H2], w1b[0:H], zH4], axis=0)   # -> bwd gates
    wih1 = gate_major(sel_f, "f") + gate_major(sel_b, "b")             # (4H, 8H)
    b1 = (gate_major((params["b_ih_l1"] + params["b_hh_l1"])[None, :], "f")
          + gate_major((params["b_ih_l1_r"] + params["b_hh_l1_r"])[None, :], "b"))
    slab1 = jnp.concatenate([wih1, jnp.pad(b1, ((0, 7), (0, 0))), whh_bd(1)],
                            axis=0)                                    # (4H+8+2H, 8H)

    # ---- fc head slab (weight row + bias) ----
    fcslab = jnp.zeros((8, H2), f32)
    fcslab = fcslab.at[0, :].set(params["fc_w"][0].astype(f32))
    fcslab = fcslab.at[1, 0].set(params["fc_b"][0].astype(f32))

    # ---- token ids: time-major rows; col0 = id(t), col1 = Vp + id(S-1-t)
    ids = jnp.pad(x_idx.astype(jnp.int32), ((0, 0), (0, Bp - B)))      # (S, Bp)
    ids2 = jnp.stack([ids.reshape(-1), (ids[::-1] + Vp).reshape(-1)], axis=1)

    out_pad = pl.pallas_call(
        _bilstm2_fc_kernel,
        out_shape=jax.ShapeDtypeStruct((Bp, 1), jnp.float32),
    )(ids2, slab0, slab1, fcslab)
    # TODO(synk): on v7x, split the fwd/bwd chains across the two TensorCores
    #             with pl.core_map + VMEM_SHARED for a further ~2x.
    return out_pad[:B]


# ----------------------------------------------------------------------------
# Pure-JAX reference (lax.scan) for correctness check
# ----------------------------------------------------------------------------
def _lstm_ref_dir(x_seq, w_ih, w_hh, b_ih, b_hh, H):
    def step(carry, x_t):
        h, c = carry
        gates = x_t @ w_ih.T + b_ih + h @ w_hh.T + b_hh
        i = jax.nn.sigmoid(gates[:, :H])
        f = jax.nn.sigmoid(gates[:, H:2 * H])
        g = jnp.tanh(gates[:, 2 * H:3 * H])
        o = jax.nn.sigmoid(gates[:, 3 * H:])
        c = f * c + i * g
        h = o * jnp.tanh(c)
        return (h, c), h

    batch = x_seq.shape[1]
    init = (jnp.zeros((batch, H), jnp.float32), jnp.zeros((batch, H), jnp.float32))
    (h, _), outs = jax.lax.scan(step, init, x_seq)
    return outs, h


def rnn_forward_ref(x_idx, params, H, num_layers=2):
    layer_in = params["embedding"][x_idx]
    fwd_h = bwd_h = None
    for layer in range(num_layers):
        fwd_out, fwd_h = _lstm_ref_dir(
            layer_in, params[f"w_ih_l{layer}"], params[f"w_hh_l{layer}"],
            params[f"b_ih_l{layer}"], params[f"b_hh_l{layer}"], H)
        bwd_out_rev, bwd_h = _lstm_ref_dir(
            layer_in[::-1], params[f"w_ih_l{layer}_r"], params[f"w_hh_l{layer}_r"],
            params[f"b_ih_l{layer}_r"], params[f"b_hh_l{layer}_r"], H)
        layer_in = jnp.concatenate([fwd_out, bwd_out_rev[::-1]], axis=-1)
    hidden = jnp.concatenate([fwd_h, bwd_h], axis=1)
    return hidden @ params["fc_w"].T + params["fc_b"]


# ----------------------------------------------------------------------------
def init_params(key, vocab_size, embedding_dim, hidden_dim, num_layers=2):
    params = {}
    scale = 1.0 / np.sqrt(hidden_dim)
    keys = iter(jax.random.split(key, 64))

    def uni(shape):
        return jax.random.uniform(next(keys), shape, jnp.float32, -scale, scale)

    params["embedding"] = jax.random.normal(
        next(keys), (vocab_size, embedding_dim), jnp.float32)
    for layer in range(num_layers):
        in_dim = embedding_dim if layer == 0 else 2 * hidden_dim
        for suf in ("", "_r"):
            params[f"w_ih_l{layer}{suf}"] = uni((4 * hidden_dim, in_dim))
            params[f"w_hh_l{layer}{suf}"] = uni((4 * hidden_dim, hidden_dim))
            params[f"b_ih_l{layer}{suf}"] = uni((4 * hidden_dim,))
            params[f"b_hh_l{layer}{suf}"] = uni((4 * hidden_dim,))
    params["fc_w"] = uni((1, 2 * hidden_dim))
    params["fc_b"] = uni((1,))
    return params


if __name__ == "__main__":
    vocab_size, embedding_dim, hidden_dim = 50, 16, 32
    seq_len, batch = 8, 2

    key = jax.random.PRNGKey(0)
    k_params, k_x = jax.random.split(key)
    params = init_params(k_params, vocab_size, embedding_dim, hidden_dim)
    x = jax.random.randint(k_x, (seq_len, batch), 0, vocab_size, dtype=jnp.int32)

    out = jax.block_until_ready(rnn_forward(x, params, hidden_dim))

    ref = jax.block_until_ready(rnn_forward_ref(x, params, hidden_dim))
    np.testing.assert_allclose(np.asarray(out), np.asarray(ref),
                               rtol=1e-4, atol=1e-5)
    assert out.shape == (batch, 1)
    print("KERNEL_OK")
</pallas_src>

<mosaic_0001>
module attributes {stable_mosaic.version = 11 : i64} {
  func.func @_bilstm2_fc_kernel(%arg0: memref<64x2xi32, #tpu.memory_space<vmem>>, %arg1: memref<176x256xf32, #tpu.memory_space<vmem>>, %arg2: memref<200x256xf32, #tpu.memory_space<vmem>>, %arg3: memref<8x64xf32, #tpu.memory_space<vmem>>, %arg4: memref<8x1xf32, #tpu.memory_space<vmem>>) attributes {dimension_semantics = [], scalar_prefetch = 0 : i64, scratch_operands = 0 : i64, tpu.core_type = #tpu.core_type<tc>} {
    %0 = tpu.iota {dimensions = array<i32: 1>} : vector<64x112xi32>
    %c0 = arith.constant 0 : index
    %c0_0 = arith.constant 0 : index
    %1 = vector.load %arg0[%c0, %c0_0] : memref<64x2xi32, #tpu.memory_space<vmem>>, vector<64x1xi32>
    %2 = vector.broadcast %1 : vector<64x1xi32> to vector<64x112xi32>
    %3 = arith.cmpi eq, %0, %2 : vector<64x112xi32>
    %c0_1 = arith.constant 0 : index
    %c1 = arith.constant 1 : index
    %4 = vector.load %arg0[%c0_1, %c1] : memref<64x2xi32, #tpu.memory_space<vmem>>, vector<64x1xi32>
    %5 = vector.broadcast %4 : vector<64x1xi32> to vector<64x112xi32>
    %6 = arith.cmpi eq, %0, %5 : vector<64x112xi32>
    %7 = arith.ori %3, %6 : vector<64x112xi1>
    %8 = arith.extui %7 : vector<64x112xi1> to vector<64x112xi32>
    %9 = arith.sitofp %8 : vector<64x112xi32> to vector<64x112xf32>
    %c0_2 = arith.constant 0 : index
    %c0_3 = arith.constant 0 : index
    %10 = vector.load %arg1[%c0_2, %c0_3] : memref<176x256xf32, #tpu.memory_space<vmem>>, vector<112x256xf32>
    %cst = arith.constant dense<0.000000e+00> : vector<64x256xf32>
    %11 = tpu.matmul %9, %10, %cst {dimension_numbers = #tpu.dot_dimension_numbers<[1], [0], [0], [1], [0, 0, 1, 1], [], []>} : vector<64x112xf32>, vector<112x256xf32>, vector<64x256xf32> -> vector<64x256xf32>
    %c112 = arith.constant 112 : index
    %c0_4 = arith.constant 0 : index
    %12 = vector.load %arg1[%c112, %c0_4] : memref<176x256xf32, #tpu.memory_space<vmem>>, vector<64x256xf32>
    %c0_5 = arith.constant 0 : index
    %c0_6 = arith.constant 0 : index
    %13 = vector.load %arg2[%c0_5, %c0_6] : memref<200x256xf32, #tpu.memory_space<vmem>>, vector<128x256xf32>
    %c128 = arith.constant 128 : index
    %c0_7 = arith.constant 0 : index
    %14 = vector.load %arg2[%c128, %c0_7] : memref<200x256xf32, #tpu.memory_space<vmem>>, vector<1x256xf32>
    %c136 = arith.constant 136 : index
    %c0_8 = arith.constant 0 : index
    %15 = vector.load %arg2[%c136, %c0_8] : memref<200x256xf32, #tpu.memory_space<vmem>>, vector<64x256xf32>
    %cst_9 = arith.constant 0.000000e+00 : f32
    %16 = vector.broadcast %cst_9 : f32 to vector<8x64xf32>
    %cst_10 = arith.constant 0.000000e+00 : f32
    %17 = vector.broadcast %cst_10 : f32 to vector<8x64xf32>
    %18 = vector.extract_strided_slice %11 {offsets = [0, 0], sizes = [8, 256], strides = [1, 1]} : vector<64x256xf32> to vector<8x256xf32>
    %cst_11 = arith.constant dense<0.000000e+00> : vector<8x256xf32>
    %19 = tpu.matmul %16, %12, %cst_11 {dimension_numbers = #tpu.dot_dimension_numbers<[1], [0], [0], [1], [0, 0, 1, 1], [], []>} : vector<8x64xf32>, vector<64x256xf32>, vector<8x256xf32> -> vector<8x256xf32>
    %20 = arith.addf %18, %19 : vector<8x256xf32>
    %21 = arith.negf %20 : vector<8x256xf32>
    %22 = math.exp %21 : vector<8x256xf32>
    %cst_12 = arith.constant 1.000000e+00 : f32
    %23 = vector.broadcast %cst_12 : f32 to vector<8x256xf32>
    %24 = arith.addf %23, %22 : vector<8x256xf32>
    %25 = arith.divf %23, %24 : vector<8x256xf32>
    %26 = math.tanh %20 : vector<8x256xf32>
    %27 = vector.extract_strided_slice %25 {offsets = [0, 64], sizes = [8, 64], strides = [1, 1]} : vector<8x256xf32> to vector<8x64xf32>
    %28 = arith.mulf %27, %17 : vector<8x64xf32>
    %29 = vector.extract_strided_slice %25 {offsets = [0, 0], sizes = [8, 64], strides = [1, 1]} : vector<8x256xf32> to vector<8x64xf32>
    %30 = vector.extract_strided_slice %26 {offsets = [0, 128], sizes = [8, 64], strides = [1, 1]} : vector<8x256xf32> to vector<8x64xf32>
    %31 = arith.mulf %29, %30 : vector<8x64xf32>
    %32 = arith.addf %28, %31 : vector<8x64xf32>
    %33 = vector.extract_strided_slice %25 {offsets = [0, 192], sizes = [8, 64], strides = [1, 1]} : vector<8x256xf32> to vector<8x64xf32>
    %34 = math.tanh %32 : vector<8x64xf32>
    %35 = arith.mulf %33, %34 : vector<8x64xf32>
    %36 = vector.extract_strided_slice %11 {offsets = [8, 0], sizes = [8, 256], strides = [1, 1]} : vector<64x256xf32> to vector<8x256xf32>
    %cst_13 = arith.constant dense<0.000000e+00> : vector<8x256xf32>
    %37 = tpu.matmul %35, %12, %cst_13 {dimension_numbers = #tpu.dot_dimension_numbers<[1], [0], [0], [1], [0, 0, 1, 1], [], []>} : vector<8x64xf32>, vector<64x256xf32>, vector<8x256xf32> -> vector<8x256xf32>
    %38 = arith.addf %36, %37 : vector<8x256xf32>
    %39 = arith.negf %38 : vector<8x256xf32>
    %40 = math.exp %39 : vector<8x256xf32>
    %cst_14 = arith.constant 1.000000e+00 : f32
    %41 = vector.broadcast %cst_14 : f32 to vector<8x256xf32>
    %42 = arith.addf %41, %40 : vector<8x256xf32>
    %43 = arith.divf %41, %42 : vector<8x256xf32>
    %44 = math.tanh %38 : vector<8x256xf32>
    %45 = vector.extract_strided_slice %43 {offsets = [0, 64], sizes = [8, 64], strides = [1, 1]} : vector<8x256xf32> to vector<8x64xf32>
    %46 = arith.mulf %45, %32 : vector<8x64xf32>
    %47 = vector.extract_strided_slice %43 {offsets = [0, 0], sizes = [8, 64], strides = [1, 1]} : vector<8x256xf32> to vector<8x64xf32>
    %48 = vector.extract_strided_slice %44 {offsets = [0, 128], sizes = [8, 64], strides = [1, 1]} : vector<8x256xf32> to vector<8x64xf32>
    %49 = arith.mulf %47, %48 : vector<8x64xf32>
    %50 = arith.addf %46, %49 : vector<8x64xf32>
    %51 = vector.extract_strided_slice %43 {offsets = [0, 192], sizes = [8, 64], strides = [1, 1]} : vector<8x256xf32> to vector<8x64xf32>
    %52 = math.tanh %50 : vector<8x64xf32>
    %53 = arith.mulf %51, %52 : vector<8x64xf32>
    %54 = vector.extract_strided_slice %11 {offsets = [16, 0], sizes = [8, 256], strides = [1, 1]} : vector<64x256xf32> to vector<8x256xf32>
    %cst_15 = arith.constant dense<0.000000e+00> : vector<8x256xf32>
    %55 = tpu.matmul %53, %12, %cst_15 {dimension_numbers = #tpu.dot_dimension_numbers<[1], [0], [0], [1], [0, 0, 1, 1], [], []>} : vector<8x64xf32>, vector<64x256xf32>, vector<8x256xf32> -> vector<8x256xf32>
    %56 = arith.addf %54, %55 : vector<8x256xf32>
    %57 = arith.negf %56 : vector<8x256xf32>
    %58 = math.exp %57 : vector<8x256xf32>
    %cst_16 = arith.constant 1.000000e+00 : f32
    %59 = vector.broadcast %cst_16 : f32 to vector<8x256xf32>
    %60 = arith.addf %59, %58 : vector<8x256xf32>
    %61 = arith.divf %59, %60 : vector<8x256xf32>
    %62 = math.tanh %56 : vector<8x256xf32>
    %63 = vector.extract_strided_slice %61 {offsets = [0, 64], sizes = [8, 64], strides = [1, 1]} : vector<8x256xf32> to vector<8x64xf32>
    %64 = arith.mulf %63, %50 : vector<8x64xf32>
    %65 = vector.extract_strided_slice %61 {offsets = [0, 0], sizes = [8, 64], strides = [1, 1]} : vector<8x256xf32> to vector<8x64xf32>
    %66 = vector.extract_strided_slice %62 {offsets = [0, 128], sizes = [8, 64], strides = [1, 1]} : vector<8x256xf32> to vector<8x64xf32>
    %67 = arith.mulf %65, %66 : vector<8x64xf32>
    %68 = arith.addf %64, %67 : vector<8x64xf32>
    %69 = vector.extract_strided_slice %61 {offsets = [0, 192], sizes = [8, 64], strides = [1, 1]} : vector<8x256xf32> to vector<8x64xf32>
    %70 = math.tanh %68 : vector<8x64xf32>
    %71 = arith.mulf %69, %70 : vector<8x64xf32>
    %72 = vector.extract_strided_slice %11 {offsets = [24, 0], sizes = [8, 256], strides = [1, 1]} : vector<64x256xf32> to vector<8x256xf32>
    %cst_17 = arith.constant dense<0.000000e+00> : vector<8x256xf32>
    %73 = tpu.matmul %71, %12, %cst_17 {dimension_numbers = #tpu.dot_dimension_numbers<[1], [0], [0], [1], [0, 0, 1, 1], [], []>} : vector<8x64xf32>, vector<64x256xf32>, vector<8x256xf32> -> vector<8x256xf32>
    %74 = arith.addf %72, %73 : vector<8x256xf32>
    %75 = arith.negf %74 : vector<8x256xf32>
    %76 = math.exp %75 : vector<8x256xf32>
    %cst_18 = arith.constant 1.000000e+00 : f32
    %77 = vector.broadcast %cst_18 : f32 to vector<8x256xf32>
    %78 = arith.addf %77, %76 : vector<8x256xf32>
    %79 = arith.divf %77, %78 : vector<8x256xf32>
    %80 = math.tanh %74 : vector<8x256xf32>
    %81 = vector.extract_strided_slice %79 {offsets = [0, 64], sizes = [8, 64], strides = [1, 1]} : vector<8x256xf32> to vector<8x64xf32>
    %82 = arith.mulf %81, %68 : vector<8x64xf32>
    %83 = vector.extract_strided_slice %79 {offsets = [0, 0], sizes = [8, 64], strides = [1, 1]} : vector<8x256xf32> to vector<8x64xf32>
    %84 = vector.extract_strided_slice %80 {offsets = [0, 128], sizes = [8, 64], strides = [1, 1]} : vector<8x256xf32> to vector<8x64xf32>
    %85 = arith.mulf %83, %84 : vector<8x64xf32>
    %86 = arith.addf %82, %85 : vector<8x64xf32>
    %87 = vector.extract_strided_slice %79 {offsets = [0, 192], sizes = [8, 64], strides = [1, 1]} : vector<8x256xf32> to vector<8x64xf32>
    %88 = math.tanh %86 : vector<8x64xf32>
    %89 = arith.mulf %87, %88 : vector<8x64xf32>
    %90 = vector.extract_strided_slice %11 {offsets = [32, 0], sizes = [8, 256], strides = [1, 1]} : vector<64x256xf32> to vector<8x256xf32>
    %cst_19 = arith.constant dense<0.000000e+00> : vector<8x256xf32>
    %91 = tpu.matmul %89, %12, %cst_19 {dimension_numbers = #tpu.dot_dimension_numbers<[1], [0], [0], [1], [0, 0, 1, 1], [], []>} : vector<8x64xf32>, vector<64x256xf32>, vector<8x256xf32> -> vector<8x256xf32>
    %92 = arith.addf %90, %91 : vector<8x256xf32>
    %93 = arith.negf %92 : vector<8x256xf32>
    %94 = math.exp %93 : vector<8x256xf32>
    %cst_20 = arith.constant 1.000000e+00 : f32
    %95 = vector.broadcast %cst_20 : f32 to vector<8x256xf32>
    %96 = arith.addf %95, %94 : vector<8x256xf32>
    %97 = arith.divf %95, %96 : vector<8x256xf32>
    %98 = math.tanh %92 : vector<8x256xf32>
    %99 = vector.extract_strided_slice %97 {offsets = [0, 64], sizes = [8, 64], strides = [1, 1]} : vector<8x256xf32> to vector<8x64xf32>
    %100 = arith.mulf %99, %86 : vector<8x64xf32>
    %101 = vector.extract_strided_slice %97 {offsets = [0, 0], sizes = [8, 64], strides = [1, 1]} : vector<8x256xf32> to vector<8x64xf32>
    %102 = vector.extract_strided_slice %98 {offsets = [0, 128], sizes = [8, 64], strides = [1, 1]} : vector<8x256xf32> to vector<8x64xf32>
    %103 = arith.mulf %101, %102 : vector<8x64xf32>
    %104 = arith.addf %100, %103 : vector<8x64xf32>
    %105 = vector.extract_strided_slice %97 {offsets = [0, 192], sizes = [8, 64], strides = [1, 1]} : vector<8x256xf32> to vector<8x64xf32>
    %106 = math.tanh %104 : vector<8x64xf32>
    %107 = arith.mulf %105, %106 : vector<8x64xf32>
    %108 = vector.extract_strided_slice %11 {offsets = [40, 0], sizes = [8, 256], strides = [1, 1]} : vector<64x256xf32> to vector<8x256xf32>
    %cst_21 = arith.constant dense<0.000000e+00> : vector<8x256xf32>
    %109 = tpu.matmul %107, %12, %cst_21 {dimension_numbers = #tpu.dot_dimension_numbers<[1], [0], [0], [1], [0, 0, 1, 1], [], []>} : vector<8x64xf32>, vector<64x256xf32>, vector<8x256xf32> -> vector<8x256xf32>
    %110 = arith.addf %108, %109 : vector<8x256xf32>
    %111 = arith.negf %110 : vector<8x256xf32>
    %112 = math.exp %111 : vector<8x256xf32>
    %cst_22 = arith.constant 1.000000e+00 : f32
    %113 = vector.broadcast %cst_22 : f32 to vector<8x256xf32>
    %114 = arith.addf %113, %112 : vector<8x256xf32>
    %115 = arith.divf %113, %114 : vector<8x256xf32>
    %116 = math.tanh %110 : vector<8x256xf32>
    %117 = vector.extract_strided_slice %115 {offsets = [0, 64], sizes = [8, 64], strides = [1, 1]} : vector<8x256xf32> to vector<8x64xf32>
    %118 = arith.mulf %117, %104 : vector<8x64xf32>
    %119 = vector.extract_strided_slice %115 {offsets = [0, 0], sizes = [8, 64], strides = [1, 1]} : vector<8x256xf32> to vector<8x64xf32>
    %120 = vector.extract_strided_slice %116 {offsets = [0, 128], sizes = [8, 64], strides = [1, 1]} : vector<8x256xf32> to vector<8x64xf32>
    %121 = arith.mulf %119, %120 : vector<8x64xf32>
    %122 = arith.addf %118, %121 : vector<8x64xf32>
    %123 = vector.extract_strided_slice %115 {offsets = [0, 192], sizes = [8, 64], strides = [1, 1]} : vector<8x256xf32> to vector<8x64xf32>
    %124 = math.tanh %122 : vector<8x64xf32>
    %125 = arith.mulf %123, %124 : vector<8x64xf32>
    %126 = vector.extract_strided_slice %11 {offsets = [48, 0], sizes = [8, 256], strides = [1, 1]} : vector<64x256xf32> to vector<8x256xf32>
    %cst_23 = arith.constant dense<0.000000e+00> : vector<8x256xf32>
    %127 = tpu.matmul %125, %12, %cst_23 {dimension_numbers = #tpu.dot_dimension_numbers<[1], [0], [0], [1], [0, 0, 1, 1], [], []>} : vector<8x64xf32>, vector<64x256xf32>, vector<8x256xf32> -> vector<8x256xf32>
    %128 = arith.addf %126, %127 : vector<8x256xf32>
    %129 = arith.negf %128 : vector<8x256xf32>
    %130 = math.exp %129 : vector<8x256xf32>
    %cst_24 = arith.constant 1.000000e+00 : f32
    %131 = vector.broadcast %cst_24 : f32 to vector<8x256xf32>
    %132 = arith.addf %131, %130 : vector<8x256xf32>
    %133 = arith.divf %131, %132 : vector<8x256xf32>
    %134 = math.tanh %128 : vector<8x256xf32>
    %135 = vector.extract_strided_slice %133 {offsets = [0, 64], sizes = [8, 64], strides = [1, 1]} : vector<8x256xf32> to vector<8x64xf32>
    %136 = arith.mulf %135, %122 : vector<8x64xf32>
    %137 = vector.extract_strided_slice %133 {offsets = [0, 0], sizes = [8, 64], strides = [1, 1]} : vector<8x256xf32> to vector<8x64xf32>
    %138 = vector.extract_strided_slice %134 {offsets = [0, 128], sizes = [8, 64], strides = [1, 1]} : vector<8x256xf32> to vector<8x64xf32>
    %139 = arith.mulf %137, %138 : vector<8x64xf32>
    %140 = arith.addf %136, %139 : vector<8x64xf32>
    %141 = vector.extract_strided_slice %133 {offsets = [0, 192], sizes = [8, 64], strides = [1, 1]} : vector<8x256xf32> to vector<8x64xf32>
    %142 = math.tanh %140 : vector<8x64xf32>
    %143 = arith.mulf %141, %142 : vector<8x64xf32>
    %144 = vector.extract_strided_slice %11 {offsets = [56, 0], sizes = [8, 256], strides = [1, 1]} : vector<64x256xf32> to vector<8x256xf32>
    %cst_25 = arith.constant dense<0.000000e+00> : vector<8x256xf32>
    %145 = tpu.matmul %143, %12, %cst_25 {dimension_numbers = #tpu.dot_dimension_numbers<[1], [0], [0], [1], [0, 0, 1, 1], [], []>} : vector<8x64xf32>, vector<64x256xf32>, vector<8x256xf32> -> vector<8x256xf32>
    %146 = arith.addf %144, %145 : vector<8x256xf32>
    %147 = arith.negf %146 : vector<8x256xf32>
    %148 = math.exp %147 : vector<8x256xf32>
    %cst_26 = arith.constant 1.000000e+00 : f32
    %149 = vector.broadcast %cst_26 : f32 to vector<8x256xf32>
    %150 = arith.addf %149, %148 : vector<8x256xf32>
    %151 = arith.divf %149, %150 : vector<8x256xf32>
    %152 = math.tanh %146 : vector<8x256xf32>
    %153 = vector.extract_strided_slice %151 {offsets = [0, 64], sizes = [8, 64], strides = [1, 1]} : vector<8x256xf32> to vector<8x64xf32>
    %154 = arith.mulf %153, %140 : vector<8x64xf32>
    %155 = vector.extract_strided_slice %151 {offsets = [0, 0], sizes = [8, 64], strides = [1, 1]} : vector<8x256xf32> to vector<8x64xf32>
    %156 = vector.extract_strided_slice %152 {offsets = [0, 128], sizes = [8, 64], strides = [1, 1]} : vector<8x256xf32> to vector<8x64xf32>
    %157 = arith.mulf %155, %156 : vector<8x64xf32>
    %158 = arith.addf %154, %157 : vector<8x64xf32>
    %159 = vector.extract_strided_slice %151 {offsets = [0, 192], sizes = [8, 64], strides = [1, 1]} : vector<8x256xf32> to vector<8x64xf32>
    %160 = math.tanh %158 : vector<8x64xf32>
    %161 = arith.mulf %159, %160 : vector<8x64xf32>
    %162 = tpu.concatenate %35, %161 in 1 : vector<8x64xf32>, vector<8x64xf32> -> vector<8x128xf32>
    %163 = tpu.concatenate %53, %143 in 1 : vector<8x64xf32>, vector<8x64xf32> -> vector<8x128xf32>
    %164 = tpu.concatenate %71, %125 in 1 : vector<8x64xf32>, vector<8x64xf32> -> vector<8x128xf32>
    %165 = tpu.concatenate %89, %107 in 1 : vector<8x64xf32>, vector<8x64xf32> -> vector<8x128xf32>
    %166 = tpu.concatenate %107, %89 in 1 : vector<8x64xf32>, vector<8x64xf32> -> vector<8x128xf32>
    %167 = tpu.concatenate %125, %71 in 1 : vector<8x64xf32>, vector<8x64xf32> -> vector<8x128xf32>
    %168 = tpu.concatenate %143, %53 in 1 : vector<8x64xf32>, vector<8x64xf32> -> vector<8x128xf32>
    %169 = tpu.concatenate %161, %35 in 1 : vector<8x64xf32>, vector<8x64xf32> -> vector<8x128xf32>
    %170 = tpu.concatenate %162, %163, %164, %165, %166, %167, %168, %169 in 0 : vector<8x128xf32>, vector<8x128xf32>, vector<8x128xf32>, vector<8x128xf32>, vector<8x128xf32>, vector<8x128xf32>, vector<8x128xf32>, vector<8x128xf32> -> vector<64x128xf32>
    %cst_27 = arith.constant dense<0.000000e+00> : vector<64x256xf32>
    %171 = tpu.matmul %170, %13, %cst_27 {dimension_numbers = #tpu.dot_dimension_numbers<[1], [0], [0], [1], [0, 0, 1, 1], [], []>} : vector<64x128xf32>, vector<128x256xf32>, vector<64x256xf32> -> vector<64x256xf32>
    %172 = vector.broadcast %14 : vector<1x256xf32> to vector<64x256xf32>
    %173 = arith.addf %171, %172 : vector<64x256xf32>
    %cst_28 = arith.constant 0.000000e+00 : f32
    %174 = vector.broadcast %cst_28 : f32 to vector<8x64xf32>
    %cst_29 = arith.constant 0.000000e+00 : f32
    %175 = vector.broadcast %cst_29 : f32 to vector<8x64xf32>
    %176 = vector.extract_strided_slice %173 {offsets = [0, 0], sizes = [8, 256], strides = [1, 1]} : vector<64x256xf32> to vector<8x256xf32>
    %cst_30 = arith.constant dense<0.000000e+00> : vector<8x256xf32>
    %177 = tpu.matmul %174, %15, %cst_30 {dimension_numbers = #tpu.dot_dimension_numbers<[1], [0], [0], [1], [0, 0, 1, 1], [], []>} : vector<8x64xf32>, vector<64x256xf32>, vector<8x256xf32> -> vector<8x256xf32>
    %178 = arith.addf %176, %177 : vector<8x256xf32>
    %179 = arith.negf %178 : vector<8x256xf32>
    %180 = math.exp %179 : vector<8x256xf32>
    %cst_31 = arith.constant 1.000000e+00 : f32
    %181 = vector.broadcast %cst_31 : f32 to vector<8x256xf32>
    %182 = arith.addf %181, %180 : vector<8x256xf32>
    %183 = arith.divf %181, %182 : vector<8x256xf32>
    %184 = math.tanh %178 : vector<8x256xf32>
    %185 = vector.extract_strided_slice %183 {offsets = [0, 64], sizes = [8, 64], strides = [1, 1]} : vector<8x256xf32> to vector<8x64xf32>
    %186 = arith.mulf %185, %175 : vector<8x64xf32>
    %187 = vector.extract_strided_slice %183 {offsets = [0, 0], sizes = [8, 64], strides = [1, 1]} : vector<8x256xf32> to vector<8x64xf32>
    %188 = vector.extract_strided_slice %184 {offsets = [0, 128], sizes = [8, 64], strides = [1, 1]} : vector<8x256xf32> to vector<8x64xf32>
    %189 = arith.mulf %187, %188 : vector<8x64xf32>
    %190 = arith.addf %186, %189 : vector<8x64xf32>
    %191 = vector.extract_strided_slice %183 {offsets = [0, 192], sizes = [8, 64], strides = [1, 1]} : vector<8x256xf32> to vector<8x64xf32>
    %192 = math.tanh %190 : vector<8x64xf32>
    %193 = arith.mulf %191, %192 : vector<8x64xf32>
    %194 = vector.extract_strided_slice %173 {offsets = [8, 0], sizes = [8, 256], strides = [1, 1]} : vector<64x256xf32> to vector<8x256xf32>
    %cst_32 = arith.constant dense<0.000000e+00> : vector<8x256xf32>
    %195 = tpu.matmul %193, %15, %cst_32 {dimension_numbers = #tpu.dot_dimension_numbers<[1], [0], [0], [1], [0, 0, 1, 1], [], []>} : vector<8x64xf32>, vector<64x256xf32>, vector<8x256xf32> -> vector<8x256xf32>
    %196 = arith.addf %194, %195 : vector<8x256xf32>
    %197 = arith.negf %196 : vector<8x256xf32>
    %198 = math.exp %197 : vector<8x256xf32>
    %cst_33 = arith.constant 1.000000e+00 : f32
    %199 = vector.broadcast %cst_33 : f32 to vector<8x256xf32>
    %200 = arith.addf %199, %198 : vector<8x256xf32>
    %201 = arith.divf %199, %200 : vector<8x256xf32>
    %202 = math.tanh %196 : vector<8x256xf32>
    %203 = vector.extract_strided_slice %201 {offsets = [0, 64], sizes = [8, 64], strides = [1, 1]} : vector<8x256xf32> to vector<8x64xf32>
    %204 = arith.mulf %203, %190 : vector<8x64xf32>
    %205 = vector.extract_strided_slice %201 {offsets = [0, 0], sizes = [8, 64], strides = [1, 1]} : vector<8x256xf32> to vector<8x64xf32>
    %206 = vector.extract_strided_slice %202 {offsets = [0, 128], sizes = [8, 64], strides = [1, 1]} : vector<8x256xf32> to vector<8x64xf32>
    %207 = arith.mulf %205, %206 : vector<8x64xf32>
    %208 = arith.addf %204, %207 : vector<8x64xf32>
    %209 = vector.extract_strided_slice %201 {offsets = [0, 192], sizes = [8, 64], strides = [1, 1]} : vector<8x256xf32> to vector<8x64xf32>
    %210 = math.tanh %208 : vector<8x64xf32>
    %211 = arith.mulf %209, %210 : vector<8x64xf32>
    %212 = vector.extract_strided_slice %173 {offsets = [16, 0], sizes = [8, 256], strides = [1, 1]} : vector<64x256xf32> to vector<8x256xf32>
    %cst_34 = arith.constant dense<0.000000e+00> : vector<8x256xf32>
    %213 = tpu.matmul %211, %15, %cst_34 {dimension_numbers = #tpu.dot_dimension_numbers<[1], [0], [0], [1], [0, 0, 1, 1], [], []>} : vector<8x64xf32>, vector<64x256xf32>, vector<8x256xf32> -> vector<8x256xf32>
    %214 = arith.addf %212, %213 : vector<8x256xf32>
    %215 = arith.negf %214 : vector<8x256xf32>
    %216 = math.exp %215 : vector<8x256xf32>
    %cst_35 = arith.constant 1.000000e+00 : f32
    %217 = vector.broadcast %cst_35 : f32 to vector<8x256xf32>
    %218 = arith.addf %217, %216 : vector<8x256xf32>
    %219 = arith.divf %217, %218 : vector<8x256xf32>
    %220 = math.tanh %214 : vector<8x256xf32>
    %221 = vector.extract_strided_slice %219 {offsets = [0, 64], sizes = [8, 64], strides = [1, 1]} : vector<8x256xf32> to vector<8x64xf32>
    %222 = arith.mulf %221, %208 : vector<8x64xf32>
    %223 = vector.extract_strided_slice %219 {offsets = [0, 0], sizes = [8, 64], strides = [1, 1]} : vector<8x256xf32> to vector<8x64xf32>
    %224 = vector.extract_strided_slice %220 {offsets = [0, 128], sizes = [8, 64], strides = [1, 1]} : vector<8x256xf32> to vector<8x64xf32>
    %225 = arith.mulf %223, %224 : vector<8x64xf32>
    %226 = arith.addf %222, %225 : vector<8x64xf32>
    %227 = vector.extract_strided_slice %219 {offsets = [0, 192], sizes = [8, 64], strides = [1, 1]} : vector<8x256xf32> to vector<8x64xf32>
    %228 = math.tanh %226 : vector<8x64xf32>
    %229 = arith.mulf %227, %228 : vector<8x64xf32>
    %230 = vector.extract_strided_slice %173 {offsets = [24, 0], sizes = [8, 256], strides = [1, 1]} : vector<64x256xf32> to vector<8x256xf32>
    %cst_36 = arith.constant dense<0.000000e+00> : vector<8x256xf32>
    %231 = tpu.matmul %229, %15, %cst_36 {dimension_numbers = #tpu.dot_dimension_numbers<[1], [0], [0], [1], [0, 0, 1, 1], [], []>} : vector<8x64xf32>, vector<64x256xf32>, vector<8x256xf32> -> vector<8x256xf32>
    %232 = arith.addf %230, %231 : vector<8x256xf32>
    %233 = arith.negf %232 : vector<8x256xf32>
    %234 = math.exp %233 : vector<8x256xf32>
    %cst_37 = arith.constant 1.000000e+00 : f32
    %235 = vector.broadcast %cst_37 : f32 to vector<8x256xf32>
    %236 = arith.addf %235, %234 : vector<8x256xf32>
    %237 = arith.divf %235, %236 : vector<8x256xf32>
    %238 = math.tanh %232 : vector<8x256xf32>
    %239 = vector.extract_strided_slice %237 {offsets = [0, 64], sizes = [8, 64], strides = [1, 1]} : vector<8x256xf32> to vector<8x64xf32>
    %240 = arith.mulf %239, %226 : vector<8x64xf32>
    %241 = vector.extract_strided_slice %237 {offsets = [0, 0], sizes = [8, 64], strides = [1, 1]} : vector<8x256xf32> to vector<8x64xf32>
    %242 = vector.extract_strided_slice %238 {offsets = [0, 128], sizes = [8, 64], strides = [1, 1]} : vector<8x256xf32> to vector<8x64xf32>
    %243 = arith.mulf %241, %242 : vector<8x64xf32>
    %244 = arith.addf %240, %243 : vector<8x64xf32>
    %245 = vector.extract_strided_slice %237 {offsets = [0, 192], sizes = [8, 64], strides = [1, 1]} : vector<8x256xf32> to vector<8x64xf32>
    %246 = math.tanh %244 : vector<8x64xf32>
    %247 = arith.mulf %245, %246 : vector<8x64xf32>
    %248 = vector.extract_strided_slice %173 {offsets = [32, 0], sizes = [8, 256], strides = [1, 1]} : vector<64x256xf32> to vector<8x256xf32>
    %cst_38 = arith.constant dense<0.000000e+00> : vector<8x256xf32>
    %249 = tpu.matmul %247, %15, %cst_38 {dimension_numbers = #tpu.dot_dimension_numbers<[1], [0], [0], [1], [0, 0, 1, 1], [], []>} : vector<8x64xf32>, vector<64x256xf32>, vector<8x256xf32> -> vector<8x256xf32>
    %250 = arith.addf %248, %249 : vector<8x256xf32>
    %251 = arith.negf %250 : vector<8x256xf32>
    %252 = math.exp %251 : vector<8x256xf32>
    %cst_39 = arith.constant 1.000000e+00 : f32
    %253 = vector.broadcast %cst_39 : f32 to vector<8x256xf32>
    %254 = arith.addf %253, %252 : vector<8x256xf32>
    %255 = arith.divf %253, %254 : vector<8x256xf32>
    %256 = math.tanh %250 : vector<8x256xf32>
    %257 = vector.extract_strided_slice %255 {offsets = [0, 64], sizes = [8, 64], strides = [1, 1]} : vector<8x256xf32> to vector<8x64xf32>
    %258 = arith.mulf %257, %244 : vector<8x64xf32>
    %259 = vector.extract_strided_slice %255 {offsets = [0, 0], sizes = [8, 64], strides = [1, 1]} : vector<8x256xf32> to vector<8x64xf32>
    %260 = vector.extract_strided_slice %256 {offsets = [0, 128], sizes = [8, 64], strides = [1, 1]} : vector<8x256xf32> to vector<8x64xf32>
    %261 = arith.mulf %259, %260 : vector<8x64xf32>
    %262 = arith.addf %258, %261 : vector<8x64xf32>
    %263 = vector.extract_strided_slice %255 {offsets = [0, 192], sizes = [8, 64], strides = [1, 1]} : vector<8x256xf32> to vector<8x64xf32>
    %264 = math.tanh %262 : vector<8x64xf32>
    %265 = arith.mulf %263, %264 : vector<8x64xf32>
    %266 = vector.extract_strided_slice %173 {offsets = [40, 0], sizes = [8, 256], strides = [1, 1]} : vector<64x256xf32> to vector<8x256xf32>
    %cst_40 = arith.constant dense<0.000000e+00> : vector<8x256xf32>
    %267 = tpu.matmul %265, %15, %cst_40 {dimension_numbers = #tpu.dot_dimension_numbers<[1], [0], [0], [1], [0, 0, 1, 1], [], []>} : vector<8x64xf32>, vector<64x256xf32>, vector<8x256xf32> -> vector<8x256xf32>
    %268 = arith.addf %266, %267 : vector<8x256xf32>
    %269 = arith.negf %268 : vector<8x256xf32>
    %270 = math.exp %269 : vector<8x256xf32>
    %cst_41 = arith.constant 1.000000e+00 : f32
    %271 = vector.broadcast %cst_41 : f32 to vector<8x256xf32>
    %272 = arith.addf %271, %270 : vector<8x256xf32>
    %273 = arith.divf %271, %272 : vector<8x256xf32>
    %274 = math.tanh %268 : vector<8x256xf32>
    %275 = vector.extract_strided_slice %273 {offsets = [0, 64], sizes = [8, 64], strides = [1, 1]} : vector<8x256xf32> to vector<8x64xf32>
    %276 = arith.mulf %275, %262 : vector<8x64xf32>
    %277 = vector.extract_strided_slice %273 {offsets = [0, 0], sizes = [8, 64], strides = [1, 1]} : vector<8x256xf32> to vector<8x64xf32>
    %278 = vector.extract_strided_slice %274 {offsets = [0, 128], sizes = [8, 64], strides = [1, 1]} : vector<8x256xf32> to vector<8x64xf32>
    %279 = arith.mulf %277, %278 : vector<8x64xf32>
    %280 = arith.addf %276, %279 : vector<8x64xf32>
    %281 = vector.extract_strided_slice %273 {offsets = [0, 192], sizes = [8, 64], strides = [1, 1]} : vector<8x256xf32> to vector<8x64xf32>
    %282 = math.tanh %280 : vector<8x64xf32>
    %283 = arith.mulf %281, %282 : vector<8x64xf32>
    %284 = vector.extract_strided_slice %173 {offsets = [48, 0], sizes = [8, 256], strides = [1, 1]} : vector<64x256xf32> to vector<8x256xf32>
    %cst_42 = arith.constant dense<0.000000e+00> : vector<8x256xf32>
    %285 = tpu.matmul %283, %15, %cst_42 {dimension_numbers = #tpu.dot_dimension_numbers<[1], [0], [0], [1], [0, 0, 1, 1], [], []>} : vector<8x64xf32>, vector<64x256xf32>, vector<8x256xf32> -> vector<8x256xf32>
    %286 = arith.addf %284, %285 : vector<8x256xf32>
    %287 = arith.negf %286 : vector<8x256xf32>
    %288 = math.exp %287 : vector<8x256xf32>
    %cst_43 = arith.constant 1.000000e+00 : f32
    %289 = vector.broadcast %cst_43 : f32 to vector<8x256xf32>
    %290 = arith.addf %289, %288 : vector<8x256xf32>
    %291 = arith.divf %289, %290 : vector<8x256xf32>
    %292 = math.tanh %286 : vector<8x256xf32>
    %293 = vector.extract_strided_slice %291 {offsets = [0, 64], sizes = [8, 64], strides = [1, 1]} : vector<8x256xf32> to vector<8x64xf32>
    %294 = arith.mulf %293, %280 : vector<8x64xf32>
    %295 = vector.extract_strided_slice %291 {offsets = [0, 0], sizes = [8, 64], strides = [1, 1]} : vector<8x256xf32> to vector<8x64xf32>
    %296 = vector.extract_strided_slice %292 {offsets = [0, 128], sizes = [8, 64], strides = [1, 1]} : vector<8x256xf32> to vector<8x64xf32>
    %297 = arith.mulf %295, %296 : vector<8x64xf32>
    %298 = arith.addf %294, %297 : vector<8x64xf32>
    %299 = vector.extract_strided_slice %291 {offsets = [0, 192], sizes = [8, 64], strides = [1, 1]} : vector<8x256xf32> to vector<8x64xf32>
    %300 = math.tanh %298 : vector<8x64xf32>
    %301 = arith.mulf %299, %300 : vector<8x64xf32>
    %302 = vector.extract_strided_slice %173 {offsets = [56, 0], sizes = [8, 256], strides = [1, 1]} : vector<64x256xf32> to vector<8x256xf32>
    %cst_44 = arith.constant dense<0.000000e+00> : vector<8x256xf32>
    %303 = tpu.matmul %301, %15, %cst_44 {dimension_numbers = #tpu.dot_dimension_numbers<[1], [0], [0], [1], [0, 0, 1, 1], [], []>} : vector<8x64xf32>, vector<64x256xf32>, vector<8x256xf32> -> vector<8x256xf32>
    %304 = arith.addf %302, %303 : vector<8x256xf32>
    %305 = arith.negf %304 : vector<8x256xf32>
    %306 = math.exp %305 : vector<8x256xf32>
    %cst_45 = arith.constant 1.000000e+00 : f32
    %307 = vector.broadcast %cst_45 : f32 to vector<8x256xf32>
    %308 = arith.addf %307, %306 : vector<8x256xf32>
    %309 = arith.divf %307, %308 : vector<8x256xf32>
    %310 = math.tanh %304 : vector<8x256xf32>
    %311 = vector.extract_strided_slice %309 {offsets = [0, 64], sizes = [8, 64], strides = [1, 1]} : vector<8x256xf32> to vector<8x64xf32>
    %312 = arith.mulf %311, %298 : vector<8x64xf32>
    %313 = vector.extract_strided_slice %309 {offsets = [0, 0], sizes = [8, 64], strides = [1, 1]} : vector<8x256xf32> to vector<8x64xf32>
    %314 = vector.extract_strided_slice %310 {offsets = [0, 128], sizes = [8, 64], strides = [1, 1]} : vector<8x256xf32> to vector<8x64xf32>
    %315 = arith.mulf %313, %314 : vector<8x64xf32>
    %316 = arith.addf %312, %315 : vector<8x64xf32>
    %317 = vector.extract_strided_slice %309 {offsets = [0, 192], sizes = [8, 64], strides = [1, 1]} : vector<8x256xf32> to vector<8x64xf32>
    %318 = math.tanh %316 : vector<8x64xf32>
    %319 = arith.mulf %317, %318 : vector<8x64xf32>
    %c0_46 = arith.constant 0 : index
    %c0_47 = arith.constant 0 : index
    %320 = vector.load %arg3[%c0_46, %c0_47] : memref<8x64xf32, #tpu.memory_space<vmem>>, vector<1x64xf32>
    %321 = vector.broadcast %320 : vector<1x64xf32> to vector<8x64xf32>
    %322 = arith.mulf %319, %321 : vector<8x64xf32>
    %cst_48 = arith.constant dense<0.000000e+00> : vector<8xf32>
    %323 = vector.multi_reduction <add>, %322, %cst_48 [1] : vector<8x64xf32> to vector<8xf32>
    %324 = vector.shape_cast %323 : vector<8xf32> to vector<8x1xf32>
    %c1_49 = arith.constant 1 : index
    %c0_50 = arith.constant 0 : index
    %325 = vector.load %arg3[%c1_49, %c0_50] : memref<8x64xf32, #tpu.memory_space<vmem>>, vector<1x1xf32>
    %326 = vector.broadcast %325 : vector<1x1xf32> to vector<8x1xf32>
    %327 = arith.addf %324, %326 : vector<8x1xf32>
    %c0_51 = arith.constant 0 : index
    %c0_52 = arith.constant 0 : index
    %328 = vector.load %arg4[%c0_51, %c0_52] : memref<8x1xf32, #tpu.memory_space<vmem>>, vector<8x1xf32>
    tpu.vector_store %arg4[%c0_51, %c0_52], %327 {strides = array<i32>} : memref<8x1xf32, #tpu.memory_space<vmem>>, vector<8x1xf32>,
    return
  }
}

</mosaic_0001>

<bundles_post_ra>
// kernel: rnn_forward.1
= control target key start
LH: loop header
LB: loop body
LE: loop exit
PB: predicated region body
PF: predicated region fallthrough
CT: control target
= control target key end

     0   :  { %v2256_v0 = vmov 0   ;;  %v2257_v7 = vmov 1   ;;  %v2258_v43 = vmov 0.0   ;;  %v17_v49 = vlaneseq  ;;  %s3202_s0 = inlined_call_operand.vmem [shape: s32[64,2], index: 0, kind: input, shape index: {}]   ;;  %s3203_s1 = inlined_call_operand.vmem [shape: f32[176,256], index: 1, kind: input, shape index: {}]   ;;  %s3204_s2 = inlined_call_operand.vmem [shape: f32[200,256], index: 2, kind: input, shape index: {}]   ;;  %s3205_s3 = inlined_call_operand.vmem [shape: f32[8,64], index: 3, kind: input, shape index: {}]   ;;  %s3206_s4 = inlined_call_operand.vmem [shape: f32[8,1], index: 4, kind: output, shape index: {}]  }
   0x1   :  { %2048 = vset.pattern.permute.xlu0 %v2256_v0  ;;  %v19_v1 = vld [vmem:[%s3202_s0] sm:$0xff]  ;;  %v141_v2 = vld [vmem:[%s3203_s1 + $0xd0] sm:$0xff]  ;;  %v142_v3 = vld [vmem:[%s3203_s1 + $0xd8] sm:$0xff]  ;;  %2050 = vset.pattern.permute.xlu2 %v2256_v0  ;;  %vm143_vm2 = vcmask 916480   ;;  %vm316_vm15 = vcmask 523264  }
   0x2   :  { %28 = vperm.xlu0 %2048, %v19_v1   ;;  %170 = vmatpush.msra.mxu0 %v141_v2  ;;  %v139_v4 = vld [vmem:[%s3203_s1 + $0xc0] sm:$0xff]  ;;  %v140_v5 = vld [vmem:[%s3203_s1 + $0xc8] sm:$0xff]  ;;  %v137_v6 = vld [vmem:[%s3203_s1 + $0xb0] sm:$0xff]  ;;  %v2521_v50 = vand.u32 127, %v17_v49 }
   0x3   :  { %211 = vmatpush.msra.mxu1 %v142_v3  ;;  %2053 = vset.pattern.permute.xlu1 %v2257_v7  ;;  %v138_v8 = vld [vmem:[%s3203_s1 + $0xb8] sm:$0xff]  ;;  %v2312_v9 = vld [vmem:[%s3203_s1 + $0x150] sm:$0xff]  ;;  %v135_v11 = vld [vmem:[%s3203_s1 + $0xa0] sm:$0xff] }
   0x4   :  { %171 = vmatpush.msra.mxu0 %v139_v4  ;;  %v2317_v10 = vld [vmem:[%s3203_s1 + $0x158] sm:$0xff]  ;;  %328 = vmatpush.msra.mxu2 %v2312_v9  ;;  %v2326_v12 = vld [vmem:[%s3203_s1 + $0x140] sm:$0xff]  ;;  %v2331_v13 = vld [vmem:[%s3203_s1 + $0x148] sm:$0xff] }
   0x5   :  { %212 = vmatpush.msra.mxu1 %v140_v5  ;;  %v136_v14 = vld [vmem:[%s3203_s1 + $0xa8] sm:$0xff]  ;;  %348 = vmatpush.msra.mxu3 %v2317_v10  ;;  %v2340_v15 = vld [vmem:[%s3203_s1 + $0x130] sm:$0xff]  ;;  %v134_v17 = vld [vmem:[%s3203_s1 + $0x98] sm:$0xff] }
   0x6   :  { %172 = vmatpush.msra.mxu0 %v137_v6  ;;  %v133_v16 = vld [vmem:[%s3203_s1 + $0x90] sm:$0xff]  ;;  %329 = vmatpush.msra.mxu2 %v2326_v12  ;;  %v131_v18 = vld [vmem:[%s3203_s1 + $0x80] sm:$0xff]  ;;  %v2357_v19 = vld [vmem:[%s3203_s1 + $0x138] sm:$0xff] }
   0x7   :  { %213 = vmatpush.msra.mxu1 %v138_v8  ;;  %349 = vmatpush.msra.mxu3 %v2331_v13  ;;  %v132_v20 = vld [vmem:[%s3203_s1 + $0x88] sm:$0xff]  ;;  %v2366_v21 = vld [vmem:[%s3203_s1 + $0x120] sm:$0xff]  ;;  %v129_v22 = vld [vmem:[%s3203_s1 + $0x70] sm:$0xff] }
   0x8   :  { %173 = vmatpush.msra.mxu0 %v135_v11  ;;  %330 = vmatpush.msra.mxu2 %v2340_v15  ;;  %v2374_v23 = vld [vmem:[%s3203_s1 + $0x128] sm:$0xff]  ;;  %v130_v24 = vld [vmem:[%s3203_s1 + $0x78] sm:$0xff]  ;;  %v2383_v25 = vld [vmem:[%s3203_s1 + $0x110] sm:$0xff] }
   0x9   :  { %214 = vmatpush.msra.mxu1 %v136_v14  ;;  %350 = vmatpush.msra.mxu3 %v2357_v19  ;;  %v127_v26 = vld [vmem:[%s3203_s1 + $0x60] sm:$0xff]  ;;  %v2392_v27 = vld [vmem:[%s3203_s1 + $0x118] sm:$0xff]  ;;  %v128_v28 = vld [vmem:[%s3203_s1 + $0x68] sm:$0xff] }
   0xa   :  { %2049 = vset.pattern.permute.xlu0 %v2257_v7  ;;  %174 = vmatpush.msra.mxu0 %v133_v16  ;;  %v125_v29 = vld [vmem:[%s3203_s1 + $0x50] sm:$0xff]  ;;  %v126_v30 = vld [vmem:[%s3203_s1 + $0x58] sm:$0xff]  ;;  %v2410_v31 = vld [vmem:[%s3203_s1 + $0x100] sm:$0xff] }
   0xb   :  { %60 = vperm.xlu0 %2049, %v19_v1   ;;  %215 = vmatpush.msra.mxu1 %v134_v17  ;;  %v2415_v32 = vld [vmem:[%s3203_s1 + $0x108] sm:$0xff]  ;;  %v123_v33 = vld [vmem:[%s3203_s1 + $0x40] sm:$0xff]  ;;  %v2428_v35 = vld [vmem:[%s3203_s1 + $0xf0] sm:$0xff] }
   0xc   :  { %175 = vmatpush.msra.mxu0 %v131_v18  ;;  %331 = vmatpush.msra.mxu2 %v2366_v21  ;;  %v124_v34 = vld [vmem:[%s3203_s1 + $0x48] sm:$0xff]  ;;  %v2433_v36 = vld [vmem:[%s3203_s1 + $0xf8] sm:$0xff]  ;;  %v121_v37 = vld [vmem:[%s3203_s1 + $0x30] sm:$0xff] }
   0xd   :  { %216 = vmatpush.msra.mxu1 %v132_v20  ;;  %351 = vmatpush.msra.mxu3 %v2374_v23  ;;  %v122_v38 = vld [vmem:[%s3203_s1 + $0x38] sm:$0xff]  ;;  %v2444_v39 = vld [vmem:[%s3203_s1 + $0xe0] sm:$0xff]  ;;  %v2449_v40 = vld [vmem:[%s3203_s1 + $0xe8] sm:$0xff] }
   0xe   :  { %176 = vmatpush.msra.mxu0 %v129_v22  ;;  %332 = vmatpush.msra.mxu2 %v2383_v25  ;;  %v119_v41 = vld [vmem:[%s3203_s1 + $0x20] sm:$0xff]  ;;  %v120_v42 = vld [vmem:[%s3203_s1 + $0x28] sm:$0xff]  ;;  %v117_v44 = vld [vmem:[%s3203_s1 + $0x10] sm:$0xff] }
   0xf   :  { %217 = vmatpush.msra.mxu1 %v130_v24  ;;  %352 = vmatpush.msra.mxu3 %v2392_v27  ;;  %v118_v45 = vld [vmem:[%s3203_s1 + $0x18] sm:$0xff]  ;;  %v115_v46 = vld [vmem:[%s3203_s1] sm:$0xff]  ;;  %v116_v47 = vld [vmem:[%s3203_s1 + $0x8] sm:$0xff]  ;;  %s2259_s1 = smov 64  }
  0x10   :  { %177 = vmatpush.msra.mxu0 %v127_v26  ;;  %333 = vmatpush.msra.mxu2 %v2410_v31  ;;  %v20_v22 = vld [vmem:[%s3202_s0 + $0x8] sm:$0xff] }
  0x11   :  { %218 = vmatpush.msra.mxu1 %v128_v28  ;;  %353 = vmatpush.msra.mxu3 %v2415_v32 }
  0x12   :  { %178 = vmatpush.msra.mxu0 %v125_v29  ;;  %334 = vmatpush.msra.mxu2 %v2428_v35 }
  0x13   :  { %2052 = vset.pattern.permute.xlu0 %v2256_v0  ;;  %219 = vmatpush.msra.mxu1 %v126_v30 }
  0x14   :  { %179 = vmatpush.msra.mxu0 %v123_v33  ;;  %354 = vmatpush.msra.mxu3 %v2433_v36 }
  0x15   :  { %220 = vmatpush.msra.mxu1 %v124_v34  ;;  %335 = vmatpush.msra.mxu2 %v2444_v39 }
  0x16   :  { %180 = vmatpush.msra.mxu0 %v121_v37  ;;  %355 = vmatpush.msra.mxu3 %v2449_v40 }
  0x17   :  { %221 = vmatpush.msra.mxu1 %v122_v38  ;;  %336 = vmatmul.f32.vlgmr.msra.gmra.mxu2 %v2258_v43 }
  0x18   :  { %356 = vmatmul.f32.vlgmr.msra.gmra.mxu3 %v2258_v43  ;;  %181 = vmatpush.msra.mxu0 %v119_v41 }
  0x19   :  { %222 = vmatpush.msra.mxu1 %v120_v42  ;;  %423 = vmatpush.msrb.mxu2 %v2312_v9 }
  0x1a   :  { %443 = vmatpush.msrb.mxu3 %v2317_v10  ;;  %182 = vmatpush.msra.mxu0 %v117_v44 }
  0x1b   :  { %223 = vmatpush.msra.mxu1 %v118_v45  ;;  %424 = vmatpush.msrb.mxu2 %v2326_v12 }
  0x1c   :  { %444 = vmatpush.msrb.mxu3 %v2331_v13  ;;  %183 = vmatpush.msra.mxu0 %v115_v46 }
  0x1d   :  { %224 = vmatpush.msra.mxu1 %v116_v47  ;;  %425 = vmatpush.msrb.mxu2 %v2340_v15 }
  0x1e   :  { %445 = vmatpush.msrb.mxu3 %v2357_v19  ;;  %803 = vmatpush.msrb.mxu0 %v2312_v9 }
  0x1f   :  { %823 = vmatpush.msrb.mxu1 %v2317_v10  ;;  %426 = vmatpush.msrb.mxu2 %v2366_v21 }
  0x20   :  { %446 = vmatpush.msrb.mxu3 %v2374_v23  ;;  %804 = vmatpush.msrb.mxu0 %v2326_v12 }
  0x21   :  { %824 = vmatpush.msrb.mxu1 %v2331_v13  ;;  %427 = vmatpush.msrb.mxu2 %v2383_v25 }
  0x22   :  { %447 = vmatpush.msrb.mxu3 %v2392_v27  ;;  %805 = vmatpush.msrb.mxu0 %v2340_v15 }
  0x23   :  { %825 = vmatpush.msrb.mxu1 %v2357_v19  ;;  %428 = vmatpush.msrb.mxu2 %v2410_v31 }
  0x24   :  { %448 = vmatpush.msrb.mxu3 %v2415_v32  ;;  %806 = vmatpush.msrb.mxu0 %v2366_v21 }
  0x25   :  { %826 = vmatpush.msrb.mxu1 %v2374_v23  ;;  %429 = vmatpush.msrb.mxu2 %v2428_v35 }
  0x26   :  { %449 = vmatpush.msrb.mxu3 %v2433_v36  ;;  %807 = vmatpush.msrb.mxu0 %v2383_v25 }
  0x27   :  { %827 = vmatpush.msrb.mxu1 %v2392_v27  ;;  %430 = vmatpush.msrb.mxu2 %v2444_v39 }
  0x28   :  { %450 = vmatpush.msrb.mxu3 %v2449_v40  ;;  %808 = vmatpush.msrb.mxu0 %v2410_v31 }
  0x29   :  { %518 = vmatpush.msra.mxu2 %v2312_v9  ;;  %828 = vmatpush.msrb.mxu1 %v2415_v32 }
  0x2a   :  { %538 = vmatpush.msra.mxu3 %v2317_v10  ;;  %809 = vmatpush.msrb.mxu0 %v2428_v35 }
  0x2b   :  { %519 = vmatpush.msra.mxu2 %v2326_v12  ;;  %829 = vmatpush.msrb.mxu1 %v2433_v36 }
  0x2c   :  { %539 = vmatpush.msra.mxu3 %v2331_v13  ;;  %810 = vmatpush.msrb.mxu0 %v2444_v39 }
  0x2d   :  { %520 = vmatpush.msra.mxu2 %v2340_v15  ;;  %830 = vmatpush.msrb.mxu1 %v2449_v40 }
  0x2e   :  { %540 = vmatpush.msra.mxu3 %v2357_v19  ;;  %31 = vperm.xlu2 %2050, %v20_v22  }
  0x2f   :  { %521 = vmatpush.msra.mxu2 %v2366_v21 }
  0x30   :  { %541 = vmatpush.msra.mxu3 %v2374_v23 }
  0x31   :  { %522 = vmatpush.msra.mxu2 %v2383_v25 }
  0x32   :  { %542 = vmatpush.msra.mxu3 %v2392_v27 }
  0x33   :  { %523 = vmatpush.msra.mxu2 %v2410_v31 }
  0x34   :  { %543 = vmatpush.msra.mxu3 %v2415_v32 }
  0x35   :  { %524 = vmatpush.msra.mxu2 %v2428_v35 }
  0x36   :  { %544 = vmatpush.msra.mxu3 %v2433_v36  ;;  %2051 = vset.pattern.permute.xlu2 %v2257_v7 }
  0x37   :  { %525 = vmatpush.msra.mxu2 %v2444_v39  ;;  %63 = vperm.xlu2 %2051, %v20_v22  }
  0x38   :  { %545 = vmatpush.msra.mxu3 %v2449_v40 }
  0x3f   :  { %2054 = vset.pattern.permute.xlu2 %v2256_v0 }
  0x74   :  { %v29_v48 = vpop.permute.xlu0 %28 }
  0x75   :  { %vm51_vm0 = vcmp.eq.s32.totalorder %v2521_v50, %v29_v48 }
  0x7d   :  { %v61_v51 = vpop.permute.xlu0 %60 }
  0x7e   :  { %vm83_vm1 = vcmp.eq.s32.totalorder %v2521_v50, %v61_v51 }
  0x7f   :  { %vm91_vm3 = vmor %vm51_vm0, %vm83_vm1 }
  0x80   :  { %v1959_v52 = vsel %vm91_vm3, 1.0, %v2258_v43 }
  0x81   :  { %1967 = vmatmul.msk.f32.vlgmr.msra.gmra.mxu0 %vm143_vm2, %v1959_v52  ;;  %1975 = vmatmul.msk.f32.vlgmr.msra.gmra.mxu1 %vm143_vm2, %v1959_v52 }
  0x82   :  { %993 = vmatpush.msra.mxu0 %v2312_v9  ;;  %1013 = vmatpush.msra.mxu1 %v2317_v10 }
  0x84   :  { %994 = vmatpush.msra.mxu0 %v2326_v12  ;;  %1014 = vmatpush.msra.mxu1 %v2331_v13 }
  0x86   :  { %995 = vmatpush.msra.mxu0 %v2340_v15  ;;  %1015 = vmatpush.msra.mxu1 %v2357_v19 }
  0x88   :  { %996 = vmatpush.msra.mxu0 %v2366_v21  ;;  %1016 = vmatpush.msra.mxu1 %v2374_v23  ;;  %v32_v48 = vpop.permute.xlu2 %31 }
  0x89   :  { %vm52_vm12 = vcmp.eq.s32.totalorder %v2521_v50, %v32_v48 }
  0x8a   :  { %997 = vmatpush.msra.mxu0 %v2383_v25  ;;  %1017 = vmatpush.msra.mxu1 %v2392_v27 }
  0x8c   :  { %998 = vmatpush.msra.mxu0 %v2410_v31  ;;  %1018 = vmatpush.msra.mxu1 %v2415_v32 }
  0x8e   :  { %999 = vmatpush.msra.mxu0 %v2428_v35  ;;  %1019 = vmatpush.msra.mxu1 %v2433_v36 }
  0x90   :  { %1000 = vmatpush.msra.mxu0 %v2444_v39  ;;  %1020 = vmatpush.msra.mxu1 %v2449_v40 }
  0x91   :  { %v64_v49 = vpop.permute.xlu2 %63 }
  0x92   :  { %vm84_vm13 = vcmp.eq.s32.totalorder %v2521_v50, %v64_v49 }
  0x93   :  { %vm92_vm14 = vmor %vm52_vm12, %vm84_vm13 }
  0x94   :  { %v1960_v51 = vsel %vm92_vm14, 1.0, %v2258_v43 }
  0x95   :  { %1968 = vmatmul.msk.f32.gmra.mxu0 %vm143_vm2, %v1960_v51  ;;  %1976 = vmatmul.msk.f32.gmra.mxu1 %vm143_vm2, %v1960_v51 }
  0x9a   :  { %v337_v53 = vpop.f32.mrf.mxu2 }
  0x9b   :  { %v357_v60 = vpop.f32.mrf.mxu3 }
  0xfe   :  { %v185_v54 = vpop.f32.mrf.mxu0  ;;  %v226_v59 = vpop.f32.mrf.mxu1 }
  0xff   :  { %v360_v55 = vadd.f32 %v337_v53, %v185_v54  ;;  %v361_v62 = vadd.f32 %v357_v60, %v226_v59 }
 0x101   :  { %v1984_v56 = vmul.f32 -1.442695, %v360_v55  ;;  %v1985_v17 = vmul.f32 -1.442695, %v361_v62 }
 0x103   :  { %2064 = vpow2.f32 %v1984_v56  ;;  %v21_v56 = vld [vmem:[%s3202_s0 + $0x10] sm:$0xff] }
 0x104   :  { %34 = vperm.xlu0 %2052, %v21_v56  }
 0x109   :  { %v2065_v57 = vpop.eup %2064 }
 0x10a   :  { %v368_v58 = vadd.f32 1.0, %v2065_v57 }
 0x10c   :  { %2066 = vrcp.f32 %v368_v58  ;;  %v381_v2 = vand.u32 2147483648, %v368_v58  ;;  %v379_v4 = vand.u32 2147483647, %v368_v58  ;;  %vm375_vm5 = vweird.f32 %v368_v58  ;;  %2055 = vset.pattern.permute.xlu0 %v2257_v7 }
 0x10d   :  { %2068 = vtanh.f32 %v361_v62 }
 0x10e   :  { %v382_v6 = vor.u32 1.1754944e-38, %v381_v2  ;;  %vm380_vm7 = vcmp.eq.f32.partialorder %v379_v4, 8.507059e+37  ;;  %2070 = vpow2.f32 %v1985_v17 }
 0x112   :  { %v2067_v61 = vpop.eup %2066  ;;  %v188_v53 = vpop.f32.mrf.mxu0 }
 0x113   :  { %v371_v63 = vmul.f32 %v2067_v61, %v368_v58  ;;  %vm376_vm4 = vweird.f32 %v2067_v61  ;;  %v2069_v11 = vpop.eup %2068 }
 0x114   :  { %vm377_vm6 = vmor %vm375_vm5, %vm376_vm4  ;;  %v2071_v18 = vpop.eup %2070 }
 0x115   :  { %v372_v1 = vsub.f32 1.0, %v371_v63  ;;  %v369_v20 = vadd.f32 1.0, %v2071_v18 }
 0x117   :  { %v373_v3 = vmul.f32 %v2067_v61, %v372_v1  ;;  %2072 = vrcp.f32 %v369_v20  ;;  %v396_v38 = vand.u32 2147483648, %v369_v20  ;;  %vm390_vm9 = vweird.f32 %v369_v20 }
 0x118   :  { %v394_v41 = vand.u32 2147483647, %v369_v20 }
 0x119   :  { %v374_v5 = vadd.f32 %v2067_v61, %v373_v3  ;;  %v397_v44 = vor.u32 1.1754944e-38, %v396_v38 }
 0x11a   :  { %vm395_vm11 = vcmp.eq.f32.partialorder %v394_v41, 8.507059e+37 }
 0x11b   :  { %v378_v8 = vsel %vm377_vm6, %v2067_v61, %v374_v5  ;;  %v229_v61 = vpop.f32.mrf.mxu1 }
 0x11c   :  { %v383_v14 = vsel %vm380_vm7, %v382_v6, %v378_v8 }
 0x11d   :  { %v402_v16 = vmul.f32 %v2069_v11, %v383_v14  ;;  %v2073_v24 = vpop.eup %2072  ;;  %v401_v30 = vmul.f32 0.0, %v383_v14 }
 0x11e   :  { %v386_v26 = vmul.f32 %v2073_v24, %v369_v20  ;;  %vm391_vm8 = vweird.f32 %v2073_v24 }
 0x11f   :  { %404 = vrot.lane.b32.xlu1 %v402_v16, %s2259_s1  ;;  %vm392_vm10 = vmor %vm390_vm9, %vm391_vm8 }
 0x120   :  { %v387_v28 = vsub.f32 1.0, %v386_v26 }
 0x122   :  { %v388_v29 = vmul.f32 %v2073_v24, %v387_v28 }
 0x124   :  { %v389_v37 = vadd.f32 %v2073_v24, %v388_v29 }
 0x126   :  { %v393_v42 = vsel %vm392_vm10, %v2073_v24, %v389_v37 }
 0x127   :  { %v398_v46 = vsel %vm395_vm11, %v397_v44, %v393_v42 }
 0x176   :  { %v35_v51 = vpop.permute.xlu0 %34 }
 0x177   :  { %vm53_vm10 = vcmp.eq.s32.totalorder %v2521_v50, %v35_v51 }
 0x191   :  { %v405_v33 = vpop.permute.xlu1 %404 }
 0x192   :  { %v2552_v34 = vadd.f32 %v405_v33, %v401_v30 }
 0x194   :  { %2074 = vtanh.f32 %v2552_v34 }
 0x19a   :  { %v2075_v45 = vpop.eup %2074 }
 0x19b   :  { %v2555_v47 = vmul.f32 %v2075_v45, %v398_v46 }
 0x19d   :  { %411 = vrot.lane.b32.xlu1 %v2555_v47, %s2259_s1 }
 0x20f   :  { %v2564_v52 = vpop.permute.xlu1 %411 }
 0x210   :  { %1986 = vmatmul.msk.f32.vlgmr.msrb.gmra.mxu2 %vm316_vm15, %v2564_v52  ;;  %1987 = vmatmul.msk.f32.vlgmr.msrb.gmra.mxu3 %vm316_vm15, %v2564_v52 }
 0x211   :  { %613 = vmatpush.msrb.mxu2 %v2312_v9  ;;  %633 = vmatpush.msrb.mxu3 %v2317_v10 }
 0x213   :  { %614 = vmatpush.msrb.mxu2 %v2326_v12  ;;  %634 = vmatpush.msrb.mxu3 %v2331_v13 }
 0x215   :  { %615 = vmatpush.msrb.mxu2 %v2340_v15  ;;  %635 = vmatpush.msrb.mxu3 %v2357_v19 }
 0x217   :  { %616 = vmatpush.msrb.mxu2 %v2366_v21  ;;  %636 = vmatpush.msrb.mxu3 %v2374_v23 }
 0x219   :  { %617 = vmatpush.msrb.mxu2 %v2383_v25  ;;  %637 = vmatpush.msrb.mxu3 %v2392_v27 }
 0x21b   :  { %618 = vmatpush.msrb.mxu2 %v2410_v31  ;;  %638 = vmatpush.msrb.mxu3 %v2415_v32 }
 0x21d   :  { %619 = vmatpush.msrb.mxu2 %v2428_v35  ;;  %639 = vmatpush.msrb.mxu3 %v2433_v36 }
 0x21f   :  { %620 = vmatpush.msrb.mxu2 %v2444_v39  ;;  %640 = vmatpush.msrb.mxu3 %v2449_v40 }
 0x293   :  { %v432_v54 = vpop.f32.mrf.mxu2  ;;  %v452_v60 = vpop.f32.mrf.mxu3 }
 0x294   :  { %v455_v55 = vadd.f32 %v432_v54, %v188_v53  ;;  %v456_v63 = vadd.f32 %v452_v60, %v229_v61 }
 0x296   :  { %v1988_v57 = vmul.f32 -1.442695, %v455_v55  ;;  %v1989_v18 = vmul.f32 -1.442695, %v456_v63 }
 0x298   :  { %2076 = vpow2.f32 %v1988_v57 }
 0x29e   :  { %v2077_v58 = vpop.eup %2076 }
 0x29f   :  { %v463_v59 = vadd.f32 1.0, %v2077_v58 }
 0x2a1   :  { %2078 = vrcp.f32 %v463_v59  ;;  %v476_v3 = vand.u32 2147483648, %v463_v59  ;;  %v474_v5 = vand.u32 2147483647, %v463_v59  ;;  %vm470_vm1 = vweird.f32 %v463_v59 }
 0x2a2   :  { %2080 = vtanh.f32 %v456_v63 }
 0x2a3   :  { %v477_v8 = vor.u32 1.1754944e-38, %v476_v3  ;;  %vm475_vm4 = vcmp.eq.f32.partialorder %v474_v5, 8.507059e+37  ;;  %2082 = vpow2.f32 %v1989_v18 }
 0x2a7   :  { %v2079_v62 = vpop.eup %2078 }
 0x2a8   :  { %v466_v1 = vmul.f32 %v2079_v62, %v463_v59  ;;  %vm471_vm0 = vweird.f32 %v2079_v62  ;;  %v2081_v14 = vpop.eup %2080 }
 0x2a9   :  { %vm472_vm3 = vmor %vm470_vm1, %vm471_vm0  ;;  %v2083_v20 = vpop.eup %2082 }
 0x2aa   :  { %v467_v2 = vsub.f32 1.0, %v466_v1  ;;  %v464_v22 = vadd.f32 1.0, %v2083_v20 }
 0x2ac   :  { %v468_v4 = vmul.f32 %v2079_v62, %v467_v2  ;;  %2084 = vrcp.f32 %v464_v22  ;;  %v491_v41 = vand.u32 2147483648, %v464_v22  ;;  %vm485_vm6 = vweird.f32 %v464_v22 }
 0x2ad   :  { %v489_v42 = vand.u32 2147483647, %v464_v22 }
 0x2ae   :  { %v469_v6 = vadd.f32 %v2079_v62, %v468_v4  ;;  %v492_v45 = vor.u32 1.1754944e-38, %v491_v41 }
 0x2af   :  { %vm490_vm8 = vcmp.eq.f32.partialorder %v489_v42, 8.507059e+37 }
 0x2b0   :  { %v473_v11 = vsel %vm472_vm3, %v2079_v62, %v469_v6 }
 0x2b1   :  { %v478_v16 = vsel %vm475_vm4, %v477_v8, %v473_v11 }
 0x2b2   :  { %v497_v17 = vmul.f32 %v2081_v14, %v478_v16  ;;  %v2085_v24 = vpop.eup %2084  ;;  %v496_v30 = vmul.f32 %v478_v16, %v2552_v34 }
 0x2b3   :  { %v481_v26 = vmul.f32 %v2085_v24, %v464_v22  ;;  %vm486_vm5 = vweird.f32 %v2085_v24 }
 0x2b4   :  { %499 = vrot.lane.b32.xlu1 %v497_v17, %s2259_s1  ;;  %vm487_vm7 = vmor %vm485_vm6, %vm486_vm5 }
 0x2b5   :  { %v482_v28 = vsub.f32 1.0, %v481_v26  ;;  %v22_v26 = vld [vmem:[%s3202_s0 + $0x18] sm:$0xff] }
 0x2b6   :  { %69 = vperm.xlu0 %2055, %v22_v26  }
 0x2b7   :  { %v483_v29 = vmul.f32 %v2085_v24, %v482_v28 }
 0x2b9   :  { %v484_v38 = vadd.f32 %v2085_v24, %v483_v29 }
 0x2bb   :  { %v488_v44 = vsel %vm487_vm7, %v2085_v24, %v484_v38 }
 0x2bc   :  { %66 = vperm.xlu1 %2053, %v21_v56   ;;  %v493_v48 = vsel %vm490_vm8, %v492_v45, %v488_v44 }
 0x2be   :  { %2058 = vset.pattern.permute.xlu0 %v2256_v0 }
 0x2c4   :  { %2056 = vset.pattern.permute.xlu1 %v2256_v0 }
 0x326   :  { %v500_v33 = vpop.permute.xlu1 %499 }
 0x327   :  { %v2593_v37 = vadd.f32 %v500_v33, %v496_v30 }
 0x329   :  { %2086 = vtanh.f32 %v2593_v37 }
 0x32e   :  { %v67_v34 = vpop.permute.xlu1 %66 }
 0x32f   :  { %v2087_v46 = vpop.eup %2086  ;;  %vm85_vm9 = vcmp.eq.s32.totalorder %v2521_v50, %v67_v34 }
 0x330   :  { %v2596_v49 = vmul.f32 %v2087_v46, %v493_v48  ;;  %vm93_vm11 = vmor %vm53_vm10, %vm85_vm9 }
 0x331   :  { %v1961_v53 = vsel %vm93_vm11, 1.0, %v2258_v43 }
 0x332   :  { %506 = vrot.lane.b32.xlu2 %v2596_v49, %s2259_s1  ;;  %1969 = vmatmul.msk.f32.gmra.mxu0 %vm143_vm2, %v1961_v53 }
 0x333   :  { %1977 = vmatmul.msk.f32.gmra.mxu1 %vm143_vm2, %v1961_v53 }
 0x38c   :  { %v2605_v54 = vpop.permute.xlu2 %506 }
 0x38d   :  { %1990 = vmatmul.msk.f32.vlgmr.msra.gmra.mxu2 %vm316_vm15, %v2605_v54  ;;  %1991 = vmatmul.msk.f32.vlgmr.msra.gmra.mxu3 %vm316_vm15, %v2605_v54 }
 0x38e   :  { %708 = vmatpush.msra.mxu2 %v2312_v9  ;;  %728 = vmatpush.msra.mxu3 %v2317_v10 }
 0x390   :  { %709 = vmatpush.msra.mxu2 %v2326_v12  ;;  %729 = vmatpush.msra.mxu3 %v2331_v13 }
 0x392   :  { %710 = vmatpush.msra.mxu2 %v2340_v15  ;;  %730 = vmatpush.msra.mxu3 %v2357_v19 }
 0x394   :  { %711 = vmatpush.msra.mxu2 %v2366_v21  ;;  %731 = vmatpush.msra.mxu3 %v2374_v23 }
 0x396   :  { %712 = vmatpush.msra.mxu2 %v2383_v25  ;;  %732 = vmatpush.msra.mxu3 %v2392_v27 }
 0x398   :  { %713 = vmatpush.msra.mxu2 %v2410_v31  ;;  %733 = vmatpush.msra.mxu3 %v2415_v32 }
 0x39a   :  { %714 = vmatpush.msra.mxu2 %v2428_v35  ;;  %734 = vmatpush.msra.mxu3 %v2433_v36 }
 0x39c   :  { %715 = vmatpush.msra.mxu2 %v2444_v39  ;;  %735 = vmatpush.msra.mxu3 %v2449_v40 }
 0x3af   :  { %v191_v55 = vpop.f32.mrf.mxu0 }
 0x3b0   :  { %v232_v61 = vpop.f32.mrf.mxu1 }
 0x410   :  { %v527_v56 = vpop.f32.mrf.mxu2  ;;  %v547_v62 = vpop.f32.mrf.mxu3 }
 0x411   :  { %v550_v57 = vadd.f32 %v527_v56, %v191_v55  ;;  %v551_v1 = vadd.f32 %v547_v62, %v232_v61  ;;  %v70_v56 = vpop.permute.xlu0 %69 }
 0x412   :  { %vm86_vm7 = vcmp.eq.s32.totalorder %v2521_v50, %v70_v56  ;;  %v26_v56 = vld [vmem:[%s3202_s0 + $0x38] sm:$0xff] }
 0x413   :  { %v1992_v58 = vmul.f32 -1.442695, %v550_v57  ;;  %v1993_v20 = vmul.f32 -1.442695, %v551_v1 }
 0x415   :  { %2088 = vpow2.f32 %v1992_v58 }
 0x41b   :  { %v2089_v59 = vpop.eup %2088 }
 0x41c   :  { %v558_v60 = vadd.f32 1.0, %v2089_v59 }
 0x41e   :  { %2090 = vrcp.f32 %v558_v60  ;;  %v571_v4 = vand.u32 2147483648, %v558_v60  ;;  %v569_v6 = vand.u32 2147483647, %v558_v60  ;;  %vm565_vm13 = vweird.f32 %v558_v60 }
 0x41f   :  { %2092 = vtanh.f32 %v551_v1  ;;  %v23_v1 = vld [vmem:[%s3202_s0 + $0x20] sm:$0xff] }
 0x420   :  { %v572_v11 = vor.u32 1.1754944e-38, %v571_v4  ;;  %vm570_vm0 = vcmp.eq.f32.partialorder %v569_v6, 8.507059e+37  ;;  %2094 = vpow2.f32 %v1993_v20 }
 0x424   :  { %v2091_v63 = vpop.eup %2090 }
 0x425   :  { %v561_v2 = vmul.f32 %v2091_v63, %v558_v60  ;;  %vm566_vm12 = vweird.f32 %v2091_v63  ;;  %v2093_v16 = vpop.eup %2092 }
 0x426   :  { %vm567_vm14 = vmor %vm565_vm13, %vm566_vm12  ;;  %v2095_v22 = vpop.eup %2094 }
 0x427   :  { %v562_v3 = vsub.f32 1.0, %v561_v2  ;;  %v559_v24 = vadd.f32 1.0, %v2095_v22  ;;  %v24_v2 = vld [vmem:[%s3202_s0 + $0x28] sm:$0xff] }
 0x429   :  { %v563_v5 = vmul.f32 %v2091_v63, %v562_v3  ;;  %2096 = vrcp.f32 %v559_v24  ;;  %v586_v45 = vand.u32 2147483648, %v559_v24  ;;  %vm580_vm3 = vweird.f32 %v559_v24 }
 0x42a   :  { %v584_v46 = vand.u32 2147483647, %v559_v24 }
 0x42b   :  { %v564_v8 = vadd.f32 %v2091_v63, %v563_v5  ;;  %v587_v34 = vor.u32 1.1754944e-38, %v586_v45 }
 0x42c   :  { %vm585_vm5 = vcmp.eq.f32.partialorder %v584_v46, 8.507059e+37 }
 0x42d   :  { %v568_v14 = vsel %vm567_vm14, %v2091_v63, %v564_v8 }
 0x42e   :  { %v573_v17 = vsel %vm570_vm0, %v572_v11, %v568_v14 }
 0x42f   :  { %v592_v18 = vmul.f32 %v2093_v16, %v573_v17  ;;  %v2097_v28 = vpop.eup %2096  ;;  %v591_v38 = vmul.f32 %v573_v17, %v2593_v37 }
 0x430   :  { %v576_v29 = vmul.f32 %v2097_v28, %v559_v24  ;;  %vm581_vm1 = vweird.f32 %v2097_v28 }
 0x431   :  { %594 = vrot.lane.b32.xlu2 %v592_v18, %s2259_s1  ;;  %vm582_vm4 = vmor %vm580_vm3, %vm581_vm1 }
 0x432   :  { %v577_v30 = vsub.f32 1.0, %v576_v29 }
 0x434   :  { %v578_v33 = vmul.f32 %v2097_v28, %v577_v30 }
 0x436   :  { %v579_v44 = vadd.f32 %v2097_v28, %v578_v33 }
 0x438   :  { %v583_v48 = vsel %vm582_vm4, %v2097_v28, %v579_v44 }
 0x439   :  { %37 = vperm.xlu2 %2054, %v22_v26   ;;  %v588_v53 = vsel %vm585_vm5, %v587_v34, %v583_v48 }
 0x441   :  { %2057 = vset.pattern.permute.xlu2 %v2257_v7 }
 0x48b   :  { %v595_v41 = vpop.permute.xlu2 %594 }
 0x48c   :  { %v2634_v42 = vadd.f32 %v595_v41, %v591_v38 }
 0x48e   :  { %2098 = vtanh.f32 %v2634_v42 }
 0x493   :  { %v38_v37 = vpop.permute.xlu2 %37 }
 0x494   :  { %v2099_v51 = vpop.eup %2098  ;;  %vm54_vm6 = vcmp.eq.s32.totalorder %v2521_v50, %v38_v37 }
 0x495   :  { %v2637_v55 = vmul.f32 %v2099_v51, %v588_v53  ;;  %vm94_vm8 = vmor %vm54_vm6, %vm86_vm7  ;;  %v25_v53 = vld [vmem:[%s3202_s0 + $0x30] sm:$0xff] }
 0x496   :  { %v1962_v57 = vsel %vm94_vm8, 1.0, %v2258_v43 }
 0x497   :  { %601 = vrot.lane.b32.xlu1 %v2637_v55, %s2259_s1  ;;  %1970 = vmatmul.msk.f32.gmra.mxu0 %vm143_vm2, %v1962_v57 }
 0x498   :  { %1978 = vmatmul.msk.f32.gmra.mxu1 %vm143_vm2, %v1962_v57 }
 0x509   :  { %v2646_v58 = vpop.permute.xlu1 %601 }
 0x50a   :  { %1994 = vmatmul.msk.f32.vlgmr.msrb.gmra.mxu2 %vm316_vm15, %v2646_v58  ;;  %1995 = vmatmul.msk.f32.vlgmr.msrb.gmra.mxu3 %vm316_vm15, %v2646_v58 }
 0x50b   :  { %898 = vmatpush.msrb.mxu2 %v2312_v9  ;;  %918 = vmatpush.msrb.mxu3 %v2317_v10 }
 0x50d   :  { %899 = vmatpush.msrb.mxu2 %v2326_v12  ;;  %919 = vmatpush.msrb.mxu3 %v2331_v13 }
 0x50f   :  { %900 = vmatpush.msrb.mxu2 %v2340_v15  ;;  %920 = vmatpush.msrb.mxu3 %v2357_v19 }
 0x511   :  { %901 = vmatpush.msrb.mxu2 %v2366_v21  ;;  %921 = vmatpush.msrb.mxu3 %v2374_v23 }
 0x513   :  { %902 = vmatpush.msrb.mxu2 %v2383_v25  ;;  %922 = vmatpush.msrb.mxu3 %v2392_v27 }
 0x514   :  { %v194_v9 = vpop.f32.mrf.mxu0 }
 0x515   :  { %903 = vmatpush.msrb.mxu2 %v2410_v31  ;;  %923 = vmatpush.msrb.mxu3 %v2415_v32  ;;  %v235_v21 = vpop.f32.mrf.mxu1 }
 0x517   :  { %904 = vmatpush.msrb.mxu2 %v2428_v35  ;;  %924 = vmatpush.msrb.mxu3 %v2433_v36 }
 0x519   :  { %905 = vmatpush.msrb.mxu2 %v2444_v39  ;;  %925 = vmatpush.msrb.mxu3 %v2449_v40 }
 0x58d   :  { %v622_v10 = vpop.f32.mrf.mxu2  ;;  %v642_v23 = vpop.f32.mrf.mxu3 }
 0x58e   :  { %v645_v12 = vadd.f32 %v622_v10, %v194_v9  ;;  %v646_v27 = vadd.f32 %v642_v23, %v235_v21 }
 0x590   :  { %v1996_v13 = vmul.f32 -1.442695, %v645_v12  ;;  %v1997_v3 = vmul.f32 -1.442695, %v646_v27 }
 0x592   :  { %2100 = vpow2.f32 %v1996_v13 }
 0x598   :  { %v2101_v15 = vpop.eup %2100 }
 0x599   :  { %v653_v19 = vadd.f32 1.0, %v2101_v15 }
 0x59b   :  { %2102 = vrcp.f32 %v653_v19  ;;  %v666_v35 = vand.u32 2147483648, %v653_v19  ;;  %v664_v39 = vand.u32 2147483647, %v653_v19  ;;  %vm660_vm10 = vweird.f32 %v653_v19 }
 0x59c   :  { %2104 = vtanh.f32 %v646_v27 }
 0x59d   :  { %v667_v59 = vor.u32 1.1754944e-38, %v666_v35  ;;  %vm665_vm12 = vcmp.eq.f32.partialorder %v664_v39, 8.507059e+37  ;;  %2106 = vpow2.f32 %v1997_v3 }
 0x5a1   :  { %v2103_v25 = vpop.eup %2102 }
 0x5a2   :  { %v656_v31 = vmul.f32 %v2103_v25, %v653_v19  ;;  %vm661_vm9 = vweird.f32 %v2103_v25  ;;  %v2105_v61 = vpop.eup %2104 }
 0x5a3   :  { %vm662_vm11 = vmor %vm660_vm10, %vm661_vm9  ;;  %v2107_v4 = vpop.eup %2106 }
 0x5a4   :  { %v657_v32 = vsub.f32 1.0, %v656_v31  ;;  %v654_v5 = vadd.f32 1.0, %v2107_v4 }
 0x5a6   :  { %v658_v36 = vmul.f32 %v2103_v25, %v657_v32  ;;  %2108 = vrcp.f32 %v654_v5  ;;  %v681_v22 = vand.u32 2147483648, %v654_v5  ;;  %vm675_vm14 = vweird.f32 %v654_v5 }
 0x5a7   :  { %v679_v24 = vand.u32 2147483647, %v654_v5 }
 0x5a8   :  { %v659_v40 = vadd.f32 %v2103_v25, %v658_v36  ;;  %v682_v28 = vor.u32 1.1754944e-38, %v681_v22 }
 0x5a9   :  { %vm680_vm1 = vcmp.eq.f32.partialorder %v679_v24, 8.507059e+37 }
 0x5aa   :  { %v663_v60 = vsel %vm662_vm11, %v2103_v25, %v659_v40 }
 0x5ab   :  { %v668_v62 = vsel %vm665_vm12, %v667_v59, %v663_v60 }
 0x5ac   :  { %v687_v63 = vmul.f32 %v2105_v61, %v668_v62  ;;  %v2109_v6 = vpop.eup %2108  ;;  %v686_v16 = vmul.f32 %v668_v62, %v2634_v42 }
 0x5ad   :  { %v671_v8 = vmul.f32 %v2109_v6, %v654_v5  ;;  %vm676_vm13 = vweird.f32 %v2109_v6 }
 0x5ae   :  { %689 = vrot.lane.b32.xlu1 %v687_v63, %s2259_s1  ;;  %vm677_vm0 = vmor %vm675_vm14, %vm676_vm13 }
 0x5af   :  { %v672_v11 = vsub.f32 1.0, %v671_v8 }
 0x5b1   :  { %v673_v14 = vmul.f32 %v2109_v6, %v672_v11 }
 0x5b3   :  { %v674_v20 = vadd.f32 %v2109_v6, %v673_v14 }
 0x5b5   :  { %v678_v26 = vsel %vm677_vm0, %v2109_v6, %v674_v20 }
 0x5b6   :  { %40 = vperm.xlu1 %2056, %v23_v1   ;;  %v683_v30 = vsel %vm680_vm1, %v682_v28, %v678_v26 }
 0x5be   :  { %43 = vperm.xlu1 %2056, %v24_v2  }
 0x5c6   :  { %2059 = vset.pattern.permute.xlu1 %v2257_v7 }
 0x5c7   :  { %78 = vperm.xlu1 %2059, %v25_v53  }
 0x5cf   :  { %81 = vperm.xlu1 %2059, %v26_v56  }
 0x620   :  { %v690_v17 = vpop.permute.xlu1 %689 }
 0x621   :  { %v2677_v18 = vadd.f32 %v690_v17, %v686_v16 }
 0x623   :  { %2110 = vtanh.f32 %v2677_v18 }
 0x628   :  { %v41_v41 = vpop.permute.xlu1 %40 }
 0x629   :  { %v2111_v29 = vpop.eup %2110  ;;  %vm55_vm3 = vcmp.eq.s32.totalorder %v2521_v50, %v41_v41 }
 0x62a   :  { %v2680_v33 = vmul.f32 %v2111_v29, %v683_v30 }
 0x62c   :  { %696 = vrot.lane.b32.xlu2 %v2680_v33, %s2259_s1 }
 0x634   :  { %72 = vperm.xlu2 %2057, %v23_v1  }
 0x63c   :  { %75 = vperm.xlu2 %2057, %v24_v2  }
 0x644   :  { %2060 = vset.pattern.permute.xlu2 %v2256_v0  ;;  %v44_v0 = vpop.permute.xlu1 %43 }
 0x645   :  { %vm56_vm6 = vcmp.eq.s32.totalorder %v2521_v50, %v44_v0  ;;  %49 = vperm.xlu2 %2060, %v26_v56  }
 0x64c   :  { %v79_v3 = vpop.permute.xlu1 %78 }
 0x64d   :  { %vm89_vm1 = vcmp.eq.s32.totalorder %v2521_v50, %v79_v3 }
 0x654   :  { %v82_v22 = vpop.permute.xlu1 %81 }
 0x686   :  { %v2685_v38 = vpop.permute.xlu2 %696 }
 0x687   :  { %1998 = vmatmul.msk.f32.vlgmr.msra.gmra.mxu2 %vm316_vm15, %v2685_v38  ;;  %1999 = vmatmul.msk.f32.vlgmr.msra.gmra.mxu3 %vm316_vm15, %v2685_v38 }
 0x68e   :  { %v73_v42 = vpop.permute.xlu2 %72 }
 0x68f   :  { %vm87_vm4 = vcmp.eq.s32.totalorder %v2521_v50, %v73_v42 }
 0x690   :  { %vm95_vm5 = vmor %vm55_vm3, %vm87_vm4 }
 0x691   :  { %v1963_v44 = vsel %vm95_vm5, 1.0, %v2258_v43 }
 0x692   :  { %1971 = vmatmul.msk.f32.gmra.mxu0 %vm143_vm2, %v1963_v44  ;;  %1979 = vmatmul.msk.f32.gmra.mxu1 %vm143_vm2, %v1963_v44 }
 0x696   :  { %v76_v45 = vpop.permute.xlu2 %75 }
 0x697   :  { %vm88_vm7 = vcmp.eq.s32.totalorder %v2521_v50, %v76_v45 }
 0x698   :  { %vm96_vm8 = vmor %vm56_vm6, %vm88_vm7  ;;  %vm90_vm6 = vcmp.eq.s32.totalorder %v2521_v50, %v82_v22 }
 0x699   :  { %v1964_v46 = vsel %vm96_vm8, 1.0, %v2258_v43 }
 0x69a   :  { %1972 = vmatmul.msk.f32.gmra.mxu0 %vm143_vm2, %v1964_v46  ;;  %1980 = vmatmul.msk.f32.gmra.mxu1 %vm143_vm2, %v1964_v46 }
 0x69f   :  { %v50_v17 = vpop.permute.xlu2 %49 }
 0x6a0   :  { %vm58_vm7 = vcmp.eq.s32.totalorder %v2521_v50, %v50_v17 }
 0x6a1   :  { %vm98_vm8 = vmor %vm58_vm7, %vm90_vm6 }
 0x6a2   :  { %v1966_v29 = vsel %vm98_vm8, 1.0, %v2258_v43 }
 0x70a   :  { %v717_v48 = vpop.f32.mrf.mxu2  ;;  %v737_v12 = vpop.f32.mrf.mxu3 }
 0x70f   :  { %v197_v34 = vpop.f32.mrf.mxu0  ;;  %v238_v10 = vpop.f32.mrf.mxu1 }
 0x710   :  { %v740_v51 = vadd.f32 %v717_v48, %v197_v34  ;;  %v741_v15 = vadd.f32 %v737_v12, %v238_v10 }
 0x712   :  { %v2000_v37 = vmul.f32 -1.442695, %v740_v51  ;;  %v2001_v59 = vmul.f32 -1.442695, %v741_v15 }
 0x714   :  { %2112 = vpow2.f32 %v2000_v37 }
 0x717   :  { %v241_v42 = vpop.f32.mrf.mxu1 }
 0x71a   :  { %v2113_v57 = vpop.eup %2112 }
 0x71b   :  { %v748_v9 = vadd.f32 1.0, %v2113_v57 }
 0x71d   :  { %2114 = vrcp.f32 %v748_v9  ;;  %v761_v23 = vand.u32 2147483648, %v748_v9  ;;  %v759_v27 = vand.u32 2147483647, %v748_v9  ;;  %vm755_vm10 = vweird.f32 %v748_v9 }
 0x71e   :  { %2116 = vtanh.f32 %v741_v15 }
 0x71f   :  { %v762_v32 = vor.u32 1.1754944e-38, %v761_v23  ;;  %vm760_vm12 = vcmp.eq.f32.partialorder %v759_v27, 8.507059e+37  ;;  %2118 = vpow2.f32 %v2001_v59 }
 0x723   :  { %v2115_v13 = vpop.eup %2114 }
 0x724   :  { %v751_v19 = vmul.f32 %v2115_v13, %v748_v9  ;;  %vm756_vm9 = vweird.f32 %v2115_v13  ;;  %v2117_v36 = vpop.eup %2116 }
 0x725   :  { %vm757_vm11 = vmor %vm755_vm10, %vm756_vm9  ;;  %v2119_v60 = vpop.eup %2118 }
 0x726   :  { %v752_v21 = vsub.f32 1.0, %v751_v19  ;;  %v749_v61 = vadd.f32 1.0, %v2119_v60 }
 0x728   :  { %v753_v25 = vmul.f32 %v2115_v13, %v752_v21  ;;  %2120 = vrcp.f32 %v749_v61  ;;  %vm770_vm14 = vweird.f32 %v749_v61  ;;  %v774_v11 = vand.u32 2147483647, %v749_v61 }
 0x72a   :  { %v754_v31 = vadd.f32 %v2115_v13, %v753_v25  ;;  %vm775_vm3 = vcmp.eq.f32.partialorder %v774_v11, 8.507059e+37 }
 0x72c   :  { %v758_v35 = vsel %vm757_vm11, %v2115_v13, %v754_v31 }
 0x72d   :  { %v763_v39 = vsel %vm760_vm12, %v762_v32, %v758_v35 }
 0x72e   :  { %v782_v40 = vmul.f32 %v2117_v36, %v763_v39  ;;  %v2121_v62 = vpop.eup %2120  ;;  %v781_v4 = vmul.f32 %v763_v39, %v2677_v18 }
 0x72f   :  { %v766_v63 = vmul.f32 %v2121_v62, %v749_v61  ;;  %vm771_vm13 = vweird.f32 %v2121_v62 }
 0x730   :  { %784 = vrot.lane.b32.xlu0 %v782_v40, %s2259_s1  ;;  %vm772_vm0 = vmor %vm770_vm14, %vm771_vm13 }
 0x731   :  { %v767_v1 = vsub.f32 1.0, %v766_v63 }
 0x733   :  { %v768_v2 = vmul.f32 %v2121_v62, %v767_v1 }
 0x735   :  { %v769_v8 = vadd.f32 %v2121_v62, %v768_v2 }
 0x737   :  { %v773_v14 = vsel %vm772_vm0, %v2121_v62, %v769_v8 }
 0x738   :  { %46 = vperm.xlu0 %2058, %v25_v53  }
 0x740   :  { %2061 = vset.pattern.permute.xlu0 %v2257_v7  ;;  %v776_v7 = vand.u32 2147483648, %v749_v61 }
 0x742   :  { %v777_v16 = vor.u32 1.1754944e-38, %v776_v7 }
 0x744   :  { %v778_v24 = vsel %vm775_vm3, %v777_v16, %v773_v14 }
 0x7a2   :  { %v785_v5 = vpop.permute.xlu0 %784 }
 0x7a3   :  { %v2710_v6 = vadd.f32 %v785_v5, %v781_v4 }
 0x7a5   :  { %2122 = vtanh.f32 %v2710_v6 }
 0x7aa   :  { %v47_v20 = vpop.permute.xlu0 %46 }
 0x7ab   :  { %v2123_v18 = vpop.eup %2122  ;;  %vm57_vm4 = vcmp.eq.s32.totalorder %v2521_v50, %v47_v20  ;;  %v200_v50 = vpop.f32.mrf.mxu0 }
 0x7ac   :  { %v2715_v26 = vmul.f32 %v2123_v18, %v778_v24  ;;  %vm97_vm5 = vmor %vm57_vm4, %vm89_vm1 }
 0x7ad   :  { %v1965_v28 = vsel %vm97_vm5, 1.0, %v2258_v43 }
 0x7ae   :  { %791 = vrot.lane.b32.xlu2 %v2715_v26, %s2259_s1  ;;  %1973 = vmatmul.msk.f32.gmra.mxu0 %vm143_vm2, %v1965_v28 }
 0x7af   :  { %1981 = vmatmul.msk.f32.gmra.mxu1 %vm143_vm2, %v1965_v28 }
 0x7b6   :  { %1974 = vmatmul.msk.f32.gmra.mxu0 %vm143_vm2, %v1966_v29 }
 0x7b7   :  { %1982 = vmatmul.msk.f32.gmra.mxu1 %vm143_vm2, %v1966_v29 }
 0x808   :  { %v2727_v30 = vpop.permute.xlu2 %791 }
 0x809   :  { %2002 = vmatmul.msk.f32.vlgmr.msrb.gmra.mxu0 %vm316_vm15, %v2727_v30  ;;  %2003 = vmatmul.msk.f32.vlgmr.msrb.gmra.mxu1 %vm316_vm15, %v2727_v30 }
 0x82b   :  { %v203_v41 = vpop.f32.mrf.mxu0 }
 0x82c   :  { %v2735_v0 = vpop.f32.mrf.mxu1 }
 0x833   :  { %v2733_v44 = vpop.f32.mrf.mxu0 }
 0x834   :  { %v2737_v34 = vpop.f32.mrf.mxu1 }
 0x886   :  { %v812_v45 = vpop.f32.mrf.mxu0  ;;  %v832_v37 = vpop.f32.mrf.mxu1 }
 0x887   :  { %v835_v46 = vadd.f32 %v812_v45, %v200_v50  ;;  %v836_v57 = vadd.f32 %v832_v37, %v241_v42 }
 0x889   :  { %v2004_v48 = vmul.f32 -1.442695, %v835_v46  ;;  %v2005_v32 = vmul.f32 -1.442695, %v836_v57 }
 0x88b   :  { %2124 = vpow2.f32 %v2004_v48 }
 0x891   :  { %v2125_v51 = vpop.eup %2124 }
 0x892   :  { %v843_v53 = vadd.f32 1.0, %v2125_v51 }
 0x894   :  { %2126 = vrcp.f32 %v843_v53  ;;  %v856_v12 = vand.u32 2147483648, %v843_v53  ;;  %v854_v15 = vand.u32 2147483647, %v843_v53  ;;  %vm850_vm9 = vweird.f32 %v843_v53 }
 0x895   :  { %2128 = vtanh.f32 %v836_v57 }
 0x896   :  { %v857_v21 = vor.u32 1.1754944e-38, %v856_v12  ;;  %vm855_vm11 = vcmp.eq.f32.partialorder %v854_v15, 8.507059e+37  ;;  %2130 = vpow2.f32 %v2005_v32 }
 0x89a   :  { %v2127_v56 = vpop.eup %2126 }
 0x89b   :  { %v846_v9 = vmul.f32 %v2127_v56, %v843_v53  ;;  %vm851_vm2 = vweird.f32 %v2127_v56  ;;  %v2129_v25 = vpop.eup %2128 }
 0x89c   :  { %vm852_vm10 = vmor %vm850_vm9, %vm851_vm2  ;;  %v2131_v35 = vpop.eup %2130 }
 0x89d   :  { %v847_v10 = vsub.f32 1.0, %v846_v9  ;;  %v844_v36 = vadd.f32 1.0, %v2131_v35 }
 0x89f   :  { %v848_v13 = vmul.f32 %v2127_v56, %v847_v10  ;;  %2132 = vrcp.f32 %v844_v36  ;;  %v871_v2 = vand.u32 2147483648, %v844_v36  ;;  %vm865_vm13 = vweird.f32 %v844_v36 }
 0x8a0   :  { %v869_v3 = vand.u32 2147483647, %v844_v36 }
 0x8a1   :  { %v849_v19 = vadd.f32 %v2127_v56, %v848_v13  ;;  %v872_v5 = vor.u32 1.1754944e-38, %v871_v2  ;;  %v295_v2 = vld [vmem:[%s3204_s2 + $0xe8] sm:$0xff] }
 0x8a2   :  { %vm870_vm0 = vcmp.eq.f32.partialorder %v869_v3, 8.507059e+37 }
 0x8a3   :  { %v853_v23 = vsel %vm852_vm10, %v2127_v56, %v849_v19 }
 0x8a4   :  { %v858_v27 = vsel %vm855_vm11, %v857_v21, %v853_v23 }
 0x8a5   :  { %v877_v31 = vmul.f32 %v2129_v25, %v858_v27  ;;  %v2133_v39 = vpop.eup %2132  ;;  %v876_v61 = vmul.f32 %v858_v27, %v2710_v6 }
 0x8a6   :  { %v861_v40 = vmul.f32 %v2133_v39, %v844_v36  ;;  %vm866_vm12 = vweird.f32 %v2133_v39 }
 0x8a7   :  { %879 = vrot.lane.b32.xlu0 %v877_v31, %s2259_s1  ;;  %vm867_vm14 = vmor %vm865_vm13, %vm866_vm12 }
 0x8a8   :  { %v862_v59 = vsub.f32 1.0, %v861_v40 }
 0x8aa   :  { %v863_v60 = vmul.f32 %v2133_v39, %v862_v59 }
 0x8ac   :  { %v864_v1 = vadd.f32 %v2133_v39, %v863_v60 }
 0x8ae   :  { %v868_v4 = vsel %vm867_vm14, %v2133_v39, %v864_v1  ;;  %v294_v1 = vld [vmem:[%s3204_s2 + $0xe0] sm:$0xff] }
 0x8af   :  { %v873_v7 = vsel %vm870_vm0, %v872_v5, %v868_v4  ;;  %v293_v4 = vld [vmem:[%s3204_s2 + $0xd8] sm:$0xff]  ;;  %v290_v5 = vld [vmem:[%s3204_s2 + $0xc0] sm:$0xff] }
 0x919   :  { %v880_v62 = vpop.permute.xlu0 %879 }
 0x91a   :  { %v882_v63 = vadd.f32 %v880_v62, %v876_v61  ;;  %v296_v62 = vld [vmem:[%s3204_s2 + $0xf0] sm:$0xff] }
 0x91b   :  { %1099 = vmatpush.msra.mxu2 %v296_v62  ;;  %v270_v62 = vld [vmem:[%s3204_s2 + $0x20] sm:$0xff] }
 0x91c   :  { %2134 = vtanh.f32 %v882_v63 }
 0x91d   :  { %1100 = vmatpush.msra.mxu2 %v294_v1  ;;  %v2876_v1 = vld [vmem:[%s3204_s2 + $0x178] sm:$0xff] }
 0x922   :  { %v2135_v8 = vpop.eup %2134 }
 0x923   :  { %v2741_v11 = vmul.f32 %v2135_v8, %v873_v7  ;;  %v291_v8 = vld [vmem:[%s3204_s2 + $0xc8] sm:$0xff]  ;;  %v288_v7 = vld [vmem:[%s3204_s2 + $0xb0] sm:$0xff] }
 0x925   :  { %886 = vrot.lane.b32.xlu1 %v2741_v11, %s2259_s1 }
 0x997   :  { %v2745_v6 = vpop.permute.xlu1 %886 }
 0x998   :  { %2006 = vmatmul.msk.f32.vlgmr.msrb.gmra.mxu2 %vm316_vm15, %v2745_v6  ;;  %2007 = vmatmul.msk.f32.vlgmr.msrb.gmra.mxu3 %vm316_vm15, %v2745_v6 }
 0xa1b   :  { %v907_v14 = vpop.f32.mrf.mxu2  ;;  %v927_v18 = vpop.f32.mrf.mxu3 }
 0xa1c   :  { %v930_v16 = vadd.f32 %v907_v14, %v203_v41  ;;  %v931_v28 = vadd.f32 %v927_v18, %v2735_v0  ;;  %v289_v14 = vld [vmem:[%s3204_s2 + $0xb8] sm:$0xff] }
 0xa1d   :  { %v285_v18 = vld [vmem:[%s3204_s2 + $0x98] sm:$0xff] }
 0xa1e   :  { %v2008_v17 = vmul.f32 -1.442695, %v930_v16  ;;  %v2009_v57 = vmul.f32 -1.442695, %v931_v28  ;;  %v286_v16 = vld [vmem:[%s3204_s2 + $0xa0] sm:$0xff] }
 0xa20   :  { %2136 = vpow2.f32 %v2008_v17  ;;  %v287_v17 = vld [vmem:[%s3204_s2 + $0xa8] sm:$0xff] }
 0xa26   :  { %v2137_v20 = vpop.eup %2136 }
 0xa27   :  { %v938_v22 = vadd.f32 1.0, %v2137_v20 }
 0xa29   :  { %2138 = vrcp.f32 %v938_v22  ;;  %v951_v42 = vand.u32 2147483648, %v938_v22  ;;  %v949_v46 = vand.u32 2147483647, %v938_v22  ;;  %vm945_vm3 = vweird.f32 %v938_v22 }
 0xa2a   :  { %2140 = vtanh.f32 %v931_v28  ;;  %v282_v28 = vld [vmem:[%s3204_s2 + $0x80] sm:$0xff] }
 0xa2b   :  { %v952_v41 = vor.u32 1.1754944e-38, %v951_v42  ;;  %vm950_vm5 = vcmp.eq.f32.partialorder %v949_v46, 8.507059e+37  ;;  %2142 = vpow2.f32 %v2009_v57  ;;  %v281_v42 = vld [vmem:[%s3204_s2 + $0x78] sm:$0xff]  ;;  %v278_v46 = vld [vmem:[%s3204_s2 + $0x60] sm:$0xff] }
 0xa2f   :  { %v2139_v24 = vpop.eup %2138 }
 0xa30   :  { %v941_v29 = vmul.f32 %v2139_v24, %v938_v22  ;;  %vm946_vm1 = vweird.f32 %v2139_v24  ;;  %v2141_v53 = vpop.eup %2140  ;;  %v284_v22 = vld [vmem:[%s3204_s2 + $0x90] sm:$0xff] }
 0xa31   :  { %vm947_vm4 = vmor %vm945_vm3, %vm946_vm1  ;;  %v2143_v0 = vpop.eup %2142 }
 0xa32   :  { %v942_v50 = vsub.f32 1.0, %v941_v29  ;;  %v939_v9 = vadd.f32 1.0, %v2143_v0  ;;  %v283_v29 = vld [vmem:[%s3204_s2 + $0x88] sm:$0xff] }
 0xa34   :  { %v943_v45 = vmul.f32 %v2139_v24, %v942_v50  ;;  %2144 = vrcp.f32 %v939_v9  ;;  %v966_v27 = vand.u32 2147483648, %v939_v9  ;;  %vm960_vm7 = vweird.f32 %v939_v9  ;;  %v280_v50 = vld [vmem:[%s3204_s2 + $0x70] sm:$0xff] }
 0xa35   :  { %v964_v31 = vand.u32 2147483647, %v939_v9 }
 0xa36   :  { %v944_v48 = vadd.f32 %v2139_v24, %v943_v45  ;;  %v967_v35 = vor.u32 1.1754944e-38, %v966_v27  ;;  %v274_v27 = vld [vmem:[%s3204_s2 + $0x40] sm:$0xff] }
 0xa37   :  { %vm965_vm2 = vcmp.eq.f32.partialorder %v964_v31, 8.507059e+37  ;;  %v275_v31 = vld [vmem:[%s3204_s2 + $0x48] sm:$0xff] }
 0xa38   :  { %v948_v51 = vsel %vm947_vm4, %v2139_v24, %v944_v48  ;;  %v279_v48 = vld [vmem:[%s3204_s2 + $0x68] sm:$0xff] }
 0xa39   :  { %v953_v37 = vsel %vm950_vm5, %v952_v41, %v948_v51 }
 0xa3a   :  { %v972_v56 = vmul.f32 %v2141_v53, %v953_v37  ;;  %v2145_v10 = vpop.eup %2144  ;;  %v971_v19 = vmul.f32 %v953_v37, %v882_v63  ;;  %v297_v63 = vld [vmem:[%s3204_s2 + $0xf8] sm:$0xff] }
 0xa3b   :  { %v956_v12 = vmul.f32 %v2145_v10, %v939_v9  ;;  %vm961_vm6 = vweird.f32 %v2145_v10  ;;  %1140 = vmatpush.msra.mxu3 %v297_v63  ;;  %v271_v63 = vld [vmem:[%s3204_s2 + $0x28] sm:$0xff] }
 0xa3c   :  { %974 = vrot.lane.b32.xlu2 %v972_v56, %s2259_s1  ;;  %vm962_vm8 = vmor %vm960_vm7, %vm961_vm6 }
 0xa3d   :  { %v957_v13 = vsub.f32 1.0, %v956_v12  ;;  %1141 = vmatpush.msra.mxu3 %v295_v2  ;;  %v2881_v2 = vld [vmem:[%s3204_s2 + $0x160] sm:$0xff] }
 0xa3f   :  { %v958_v15 = vmul.f32 %v2145_v10, %v957_v13  ;;  %1142 = vmatpush.msra.mxu3 %v293_v4  ;;  %v269_v4 = vld [vmem:[%s3204_s2 + $0x18] sm:$0xff] }
 0xa41   :  { %v959_v25 = vadd.f32 %v2145_v10, %v958_v15  ;;  %1143 = vmatpush.msra.mxu3 %v291_v8  ;;  %v2901_v8 = vld [vmem:[%s3204_s2 + $0x150] sm:$0xff] }
 0xa43   :  { %v963_v32 = vsel %vm962_vm8, %v2145_v10, %v959_v25  ;;  %1144 = vmatpush.msra.mxu3 %v289_v14  ;;  %v277_v25 = vld [vmem:[%s3204_s2 + $0x58] sm:$0xff]  ;;  %v266_v14 = vld [vmem:[%s3204_s2] sm:$0xff] }
 0xa44   :  { %v968_v39 = vsel %vm965_vm2, %v967_v35, %v963_v32  ;;  %v272_v32 = vld [vmem:[%s3204_s2 + $0x30] sm:$0xff]  ;;  %v273_v35 = vld [vmem:[%s3204_s2 + $0x38] sm:$0xff] }
 0xa45   :  { %1145 = vmatpush.msra.mxu3 %v287_v17  ;;  %v2922_v17 = vld [vmem:[%s3204_s2 + $0x140] sm:$0xff] }
 0xa47   :  { %1146 = vmatpush.msra.mxu3 %v285_v18  ;;  %v2939_v18 = vld [vmem:[%s3204_s2 + $0x138] sm:$0xff] }
 0xa49   :  { %1147 = vmatpush.msra.mxu3 %v283_v29  ;;  %v2958_v29 = vld [vmem:[%s3204_s2 + $0x110] sm:$0xff] }
 0xa4b   :  { %1148 = vmatpush.msra.mxu3 %v281_v42 }
 0xa4d   :  { %1149 = vmatpush.msra.mxu3 %v279_v48 }
 0xa4f   :  { %1150 = vmatpush.msra.mxu3 %v277_v25 }
 0xa51   :  { %1151 = vmatpush.msra.mxu3 %v275_v31 }
 0xa53   :  { %1152 = vmatpush.msra.mxu3 %v273_v35 }
 0xa55   :  { %1153 = vmatpush.msra.mxu3 %v271_v63 }
 0xa57   :  { %1154 = vmatpush.msra.mxu3 %v269_v4 }
 0xa96   :  { %v975_v21 = vpop.permute.xlu2 %974 }
 0xa97   :  { %v2753_v23 = vadd.f32 %v975_v21, %v971_v19  ;;  %v276_v21 = vld [vmem:[%s3204_s2 + $0x50] sm:$0xff] }
 0xa99   :  { %2146 = vtanh.f32 %v2753_v23 }
 0xa9f   :  { %v2147_v36 = vpop.eup %2146 }
 0xaa0   :  { %v2756_v40 = vmul.f32 %v2147_v36, %v968_v39  ;;  %v2853_v36 = vld [vmem:[%s3204_s2 + $0x180] sm:$0xff]  ;;  %v2858_v39 = vld [vmem:[%s3204_s2 + $0x188] sm:$0xff] }
 0xaa1   :  { %1189 = vmatpush.msrb.mxu0 %v2853_v36  ;;  %1209 = vmatpush.msrb.mxu1 %v2858_v39 }
 0xaa2   :  { %981 = vrot.lane.b32.xlu0 %v2756_v40, %s2259_s1 }
 0xaa3   :  { %1210 = vmatpush.msrb.mxu1 %v2876_v1 }
 0xb14   :  { %v2760_v59 = vpop.permute.xlu0 %981 }
 0xb15   :  { %2010 = vmatmul.msk.f32.vlgmr.msra.gmra.mxu0 %vm316_vm15, %v2760_v59  ;;  %2011 = vmatmul.msk.f32.vlgmr.msra.gmra.mxu1 %vm316_vm15, %v2760_v59 }
 0xb92   :  { %v1002_v60 = vpop.f32.mrf.mxu0  ;;  %v1022_v45 = vpop.f32.mrf.mxu1 }
 0xb93   :  { %v1025_v61 = vadd.f32 %v1002_v60, %v2733_v44  ;;  %v292_v44 = vld [vmem:[%s3204_s2 + $0xd0] sm:$0xff]  ;;  %v1026_v51 = vadd.f32 %v1022_v45, %v2737_v34 }
 0xb94   :  { %1101 = vmatpush.msra.mxu2 %v292_v44  ;;  %v2863_v60 = vld [vmem:[%s3204_s2 + $0x170] sm:$0xff] }
 0xb95   :  { %v2012_v3 = vmul.f32 -1.442695, %v1025_v61  ;;  %v2013_v19 = vmul.f32 -1.442695, %v1026_v51  ;;  %1190 = vmatpush.msrb.mxu0 %v2863_v60  ;;  %v268_v44 = vld [vmem:[%s3204_s2 + $0x10] sm:$0xff] }
 0xb96   :  { %1102 = vmatpush.msra.mxu2 %v290_v5 }
 0xb97   :  { %2148 = vpow2.f32 %v2012_v3  ;;  %v2886_v3 = vld [vmem:[%s3204_s2 + $0x168] sm:$0xff]  ;;  %1191 = vmatpush.msrb.mxu0 %v2881_v2 }
 0xb98   :  { %1103 = vmatpush.msra.mxu2 %v288_v7  ;;  %v2906_v7 = vld [vmem:[%s3204_s2 + $0x158] sm:$0xff]  ;;  %1211 = vmatpush.msrb.mxu1 %v2886_v3 }
 0xb99   :  { %1192 = vmatpush.msrb.mxu0 %v2901_v8 }
 0xb9a   :  { %1104 = vmatpush.msra.mxu2 %v286_v16  ;;  %v267_v16 = vld [vmem:[%s3204_s2 + $0x8] sm:$0xff]  ;;  %1212 = vmatpush.msrb.mxu1 %v2906_v7 }
 0xb9b   :  { %1155 = vmatpush.msra.mxu3 %v267_v16  ;;  %1193 = vmatpush.msrb.mxu0 %v2922_v17 }
 0xb9c   :  { %1105 = vmatpush.msra.mxu2 %v284_v22  ;;  %v2932_v22 = vld [vmem:[%s3204_s2 + $0x130] sm:$0xff] }
 0xb9d   :  { %v2149_v20 = vpop.eup %2148  ;;  %1684 = vmatpush.msrb.mxu3 %v2858_v39  ;;  %1194 = vmatpush.msrb.mxu0 %v2932_v22 }
 0xb9e   :  { %v1033_v24 = vadd.f32 1.0, %v2149_v20  ;;  %1106 = vmatpush.msra.mxu2 %v282_v28  ;;  %v2927_v20 = vld [vmem:[%s3204_s2 + $0x148] sm:$0xff] }
 0xb9f   :  { %1213 = vmatpush.msrb.mxu1 %v2927_v20  ;;  %v2949_v28 = vld [vmem:[%s3204_s2 + $0x128] sm:$0xff]  ;;  %1685 = vmatpush.msrb.mxu3 %v2876_v1 }
 0xba0   :  { %2150 = vrcp.f32 %v1033_v24  ;;  %1107 = vmatpush.msra.mxu2 %v280_v50  ;;  %v1046_v56 = vand.u32 2147483648, %v1033_v24  ;;  %v1044_v0 = vand.u32 2147483647, %v1033_v24  ;;  %vm1040_vm10 = vweird.f32 %v1033_v24  ;;  %v2963_v50 = vld [vmem:[%s3204_s2 + $0x118] sm:$0xff] }
 0xba1   :  { %2152 = vtanh.f32 %v1026_v51  ;;  %1214 = vmatpush.msrb.mxu1 %v2939_v18  ;;  %1686 = vmatpush.msrb.mxu3 %v2886_v3 }
 0xba2   :  { %1108 = vmatpush.msra.mxu2 %v278_v46  ;;  %v1047_v10 = vor.u32 1.1754944e-38, %v1046_v56  ;;  %vm1045_vm12 = vcmp.eq.f32.partialorder %v1044_v0, 8.507059e+37  ;;  %2154 = vpow2.f32 %v2013_v19 }
 0xba3   :  { %1215 = vmatpush.msrb.mxu1 %v2949_v28  ;;  %1687 = vmatpush.msrb.mxu3 %v2906_v7 }
 0xba4   :  { %1109 = vmatpush.msra.mxu2 %v276_v21 }
 0xba5   :  { %1216 = vmatpush.msrb.mxu1 %v2963_v50  ;;  %1688 = vmatpush.msrb.mxu3 %v2927_v20 }
 0xba6   :  { %v2151_v41 = vpop.eup %2150  ;;  %1110 = vmatpush.msra.mxu2 %v274_v27  ;;  %1217 = vmatmul.f32.vlgmr.msrb.gmra.mxu1 %v2258_v43 }
 0xba7   :  { %v1036_v53 = vmul.f32 %v2151_v41, %v1033_v24  ;;  %vm1041_vm9 = vweird.f32 %v2151_v41  ;;  %v2153_v13 = vpop.eup %2152  ;;  %v2944_v24 = vld [vmem:[%s3204_s2 + $0x120] sm:$0xff]  ;;  %1304 = vmatpush.msra.mxu1 %v2858_v39  ;;  %1689 = vmatpush.msrb.mxu3 %v2939_v18 }
 0xba8   :  { %vm1042_vm11 = vmor %vm1040_vm10, %vm1041_vm9  ;;  %v2155_v61 = vpop.eup %2154  ;;  %1111 = vmatpush.msra.mxu2 %v272_v32  ;;  %1195 = vmatpush.msrb.mxu0 %v2944_v24 }
 0xba9   :  { %v1037_v37 = vsub.f32 1.0, %v1036_v53  ;;  %v2896_v5 = vadd.f32 1.0, %v2155_v61  ;;  %1305 = vmatpush.msra.mxu1 %v2876_v1  ;;  %1690 = vmatpush.msrb.mxu3 %v2949_v28 }
 0xbaa   :  { %1112 = vmatpush.msra.mxu2 %v270_v62  ;;  %1196 = vmatpush.msrb.mxu0 %v2958_v29 }
 0xbab   :  { %v1038_v57 = vmul.f32 %v2151_v41, %v1037_v37  ;;  %2156 = vrcp.f32 %v2896_v5  ;;  %1197 = vmatmul.f32.vlgmr.msrb.gmra.mxu0 %v2258_v43  ;;  %1306 = vmatpush.msra.mxu1 %v2886_v3  ;;  %v1061_v37 = vand.u32 2147483648, %v2896_v5  ;;  %vm1055_vm14 = vweird.f32 %v2896_v5 }
 0xbac   :  { %1113 = vmatpush.msra.mxu2 %v268_v44  ;;  %1284 = vmatpush.msra.mxu0 %v2853_v36 }
 0xbad   :  { %v1039_v9 = vadd.f32 %v2151_v41, %v1038_v57  ;;  %1307 = vmatpush.msra.mxu1 %v2906_v7  ;;  %1691 = vmatpush.msrb.mxu3 %v2963_v50  ;;  %v1062_v57 = vor.u32 1.1754944e-38, %v1061_v37 }
 0xbae   :  { %1114 = vmatpush.msra.mxu2 %v266_v14  ;;  %1285 = vmatpush.msra.mxu0 %v2863_v60 }
 0xbaf   :  { %v1043_v12 = vsel %vm1042_vm11, %v2151_v41, %v1039_v9  ;;  %1308 = vmatpush.msra.mxu1 %v2927_v20 }
 0xbb0   :  { %v2828_v15 = vsel %vm1045_vm12, %v1047_v10, %v1043_v12  ;;  %1664 = vmatpush.msrb.mxu2 %v2853_v36  ;;  %1286 = vmatpush.msra.mxu0 %v2881_v2 }
 0xbb1   :  { %v1067_v34 = vmul.f32 %v2153_v13, %v2828_v15  ;;  %v2157_v42 = vpop.eup %2156  ;;  %v1066_v48 = vmul.f32 %v2828_v15, %v2753_v23  ;;  %1309 = vmatpush.msra.mxu1 %v2939_v18  ;;  %v1059_v23 = vand.u32 2147483647, %v2896_v5  ;;  %v1088_v13 = vsel %vm316_vm15, %v2760_v59, %v2596_v49 }
 0xbb2   :  { %1665 = vmatpush.msrb.mxu2 %v2863_v60  ;;  %v1051_v45 = vmul.f32 %v2157_v42, %v2896_v5  ;;  %1287 = vmatpush.msra.mxu0 %v2901_v8  ;;  %vm1056_vm13 = vweird.f32 %v2157_v42 }
 0xbb3   :  { %1069 = vrot.lane.b32.xlu1 %v1067_v34, %s2259_s1  ;;  %1310 = vmatpush.msra.mxu1 %v2949_v28  ;;  %vm1057_vm0 = vmor %vm1055_vm14, %vm1056_vm13  ;;  %vm1060_vm1 = vcmp.eq.f32.partialorder %v1059_v23, 8.507059e+37 }
 0xbb4   :  { %1666 = vmatpush.msrb.mxu2 %v2881_v2  ;;  %v1052_v46 = vsub.f32 1.0, %v1051_v45  ;;  %1288 = vmatpush.msra.mxu0 %v2922_v17 }
 0xbb5   :  { %1311 = vmatpush.msra.mxu1 %v2963_v50 }
 0xbb6   :  { %1667 = vmatpush.msrb.mxu2 %v2901_v8  ;;  %v1053_v43 = vmul.f32 %v2157_v42, %v1052_v46  ;;  %1289 = vmatpush.msra.mxu0 %v2932_v22 }
 0xbb7   :  { %1399 = vmatpush.msrb.mxu1 %v2858_v39 }
 0xbb8   :  { %1668 = vmatpush.msrb.mxu2 %v2922_v17  ;;  %v1054_v53 = vadd.f32 %v2157_v42, %v1053_v43  ;;  %1290 = vmatpush.msra.mxu0 %v2944_v24 }
 0xbb9   :  { %1400 = vmatpush.msrb.mxu1 %v2876_v1 }
 0xbba   :  { %1669 = vmatpush.msrb.mxu2 %v2932_v22  ;;  %1291 = vmatpush.msra.mxu0 %v2958_v29  ;;  %v1058_v56 = vsel %vm1057_vm0, %v2157_v42, %v1054_v53 }
 0xbbb   :  { %v1063_v9 = vsel %vm1060_vm1, %v1062_v57, %v1058_v56  ;;  %1401 = vmatpush.msrb.mxu1 %v2886_v3 }
 0xbbc   :  { %1670 = vmatpush.msrb.mxu2 %v2944_v24  ;;  %1379 = vmatpush.msrb.mxu0 %v2853_v36 }
 0xbbd   :  { %1402 = vmatpush.msrb.mxu1 %v2906_v7 }
 0xbbe   :  { %1671 = vmatpush.msrb.mxu2 %v2958_v29  ;;  %1380 = vmatpush.msrb.mxu0 %v2863_v60 }
 0xbbf   :  { %1403 = vmatpush.msrb.mxu1 %v2927_v20 }
 0xbc0   :  { %1381 = vmatpush.msrb.mxu0 %v2881_v2 }
 0xbc1   :  { %1404 = vmatpush.msrb.mxu1 %v2939_v18 }
 0xbc2   :  { %1382 = vmatpush.msrb.mxu0 %v2901_v8 }
 0xbc3   :  { %1405 = vmatpush.msrb.mxu1 %v2949_v28 }
 0xbc4   :  { %1383 = vmatpush.msrb.mxu0 %v2922_v17 }
 0xbc5   :  { %1406 = vmatpush.msrb.mxu1 %v2963_v50 }
 0xbc6   :  { %1384 = vmatpush.msrb.mxu0 %v2932_v22 }
 0xbc8   :  { %1385 = vmatpush.msrb.mxu0 %v2944_v24 }
 0xbca   :  { %1386 = vmatpush.msrb.mxu0 %v2958_v29 }
 0xc23   :  { %v1218_v25 = vpop.f32.mrf.mxu1 }
 0xc25   :  { %v1070_v41 = vpop.permute.xlu1 %1069 }
 0xc26   :  { %v1072_v51 = vadd.f32 %v1070_v41, %v1066_v48 }
 0xc28   :  { %2158 = vtanh.f32 %v1072_v51 }
 0xc2e   :  { %v2159_v0 = vpop.eup %2158 }
 0xc2f   :  { %v3013_v10 = vmul.f32 %v2159_v0, %v1063_v9 }
 0xc31   :  { %v1076_v12 = vsel %vm316_vm15, %v2564_v52, %v3013_v10  ;;  %v1078_v52 = vsel %vm316_vm15, %v2605_v54, %v2756_v40  ;;  %v1080_v54 = vsel %vm316_vm15, %v2646_v58, %v2741_v11  ;;  %v1082_v40 = vsel %vm316_vm15, %v2685_v38, %v2715_v26  ;;  %v1983_v38 = vld [vmem:[%s3204_s2 + $0x100] ss:$8 sm:$0x3] }
 0xc32   :  { %1115 = vmatmul.f32.vlgmr.msra.gmra.mxu2 %v1076_v12  ;;  %1156 = vmatmul.f32.vlgmr.msra.gmra.mxu3 %v1076_v12  ;;  %v1084_v58 = vsel %vm316_vm15, %v2727_v30, %v2680_v33  ;;  %v1086_v11 = vsel %vm316_vm15, %v2745_v6, %v2637_v55  ;;  %v3065_v26 = vperm.slane %v1983_v38, 0  ;;  %v1198_v30 = vpop.f32.mrf.mxu0  ;;  %v3068_v19 = vperm.slane %v1983_v38, 1 }
 0xc33   :  { %1854 = vmatpush.msra.mxu2 %v2853_v36  ;;  %1874 = vmatpush.msra.mxu3 %v2858_v39 }
 0xc35   :  { %1855 = vmatpush.msra.mxu2 %v2863_v60  ;;  %1875 = vmatpush.msra.mxu3 %v2876_v1 }
 0xc37   :  { %1856 = vmatpush.msra.mxu2 %v2881_v2  ;;  %1876 = vmatpush.msra.mxu3 %v2886_v3 }
 0xc39   :  { %1857 = vmatpush.msra.mxu2 %v2901_v8  ;;  %1877 = vmatpush.msra.mxu3 %v2906_v7 }
 0xc3a   :  { %1118 = vmatmul.f32.gmra.mxu2 %v1078_v52  ;;  %1159 = vmatmul.f32.gmra.mxu3 %v1078_v52 }
 0xc3b   :  { %1858 = vmatpush.msra.mxu2 %v2922_v17  ;;  %1878 = vmatpush.msra.mxu3 %v2927_v20 }
 0xc3d   :  { %1859 = vmatpush.msra.mxu2 %v2932_v22  ;;  %1879 = vmatpush.msra.mxu3 %v2939_v18 }
 0xc3f   :  { %1860 = vmatpush.msra.mxu2 %v2944_v24  ;;  %1880 = vmatpush.msra.mxu3 %v2949_v28 }
 0xc41   :  { %1861 = vmatpush.msra.mxu2 %v2958_v29  ;;  %1881 = vmatpush.msra.mxu3 %v2963_v50 }
 0xc42   :  { %1121 = vmatmul.f32.gmra.mxu2 %v1080_v54  ;;  %1162 = vmatmul.f32.gmra.mxu3 %v1080_v54 }
 0xc4a   :  { %1124 = vmatmul.f32.gmra.mxu2 %v1082_v40  ;;  %1165 = vmatmul.f32.gmra.mxu3 %v1082_v40 }
 0xc52   :  { %1127 = vmatmul.f32.gmra.mxu2 %v1084_v58  ;;  %1168 = vmatmul.f32.gmra.mxu3 %v1084_v58 }
 0xc5a   :  { %1130 = vmatmul.f32.gmra.mxu2 %v1086_v11  ;;  %1171 = vmatmul.f32.gmra.mxu3 %v1086_v11 }
 0xc62   :  { %1133 = vmatmul.f32.gmra.mxu2 %v1088_v13  ;;  %1174 = vmatmul.f32.gmra.mxu3 %v1088_v13 }
 0xcb5   :  { %v1116_v33 = vpop.f32.mrf.mxu2  ;;  %v1157_v49 = vpop.f32.mrf.mxu3 }
 0xcb6   :  { %v1117_v15 = vadd.f32 %v1116_v33, %v3065_v26  ;;  %v1158_v59 = vadd.f32 %v1157_v49, %v3068_v19 }
 0xcb8   :  { %v1221_v34 = vadd.f32 %v1198_v30, %v1117_v15  ;;  %v1222_v31 = vadd.f32 %v1218_v25, %v1158_v59 }
 0xcba   :  { %v2014_v55 = vmul.f32 -1.442695, %v1221_v34  ;;  %v2015_v45 = vmul.f32 -1.442695, %v1222_v31 }
 0xcbc   :  { %2160 = vpow2.f32 %v2014_v55 }
 0xcbd   :  { %v1119_v13 = vpop.f32.mrf.mxu2 }
 0xcbe   :  { %v1120_v38 = vadd.f32 %v1119_v13, %v3065_v26 }
 0xcc2   :  { %v2161_v6 = vpop.eup %2160 }
 0xcc3   :  { %v1229_v21 = vadd.f32 1.0, %v2161_v6  ;;  %v1160_v6 = vpop.f32.mrf.mxu3 }
 0xcc4   :  { %v1161_v49 = vadd.f32 %v1160_v6, %v3068_v19 }
 0xcc5   :  { %2162 = vrcp.f32 %v1229_v21  ;;  %v1242_v61 = vand.u32 2147483648, %v1229_v21  ;;  %v1240_v63 = vand.u32 2147483647, %v1229_v21  ;;  %vm1236_vm4 = vweird.f32 %v1229_v21 }
 0xcc6   :  { %2164 = vtanh.f32 %v1222_v31 }
 0xcc7   :  { %v1243_v4 = vor.u32 1.1754944e-38, %v1242_v61  ;;  %vm1241_vm6 = vcmp.eq.f32.partialorder %v1240_v63, 8.507059e+37  ;;  %2166 = vpow2.f32 %v2015_v45 }
 0xccb   :  { %v2163_v27 = vpop.eup %2162 }
 0xccc   :  { %v1232_v32 = vmul.f32 %v2163_v27, %v1229_v21  ;;  %vm1237_vm3 = vweird.f32 %v2163_v27  ;;  %v2165_v14 = vpop.eup %2164 }
 0xccd   :  { %vm1238_vm5 = vmor %vm1236_vm4, %vm1237_vm3  ;;  %v2167_v46 = vpop.eup %2166 }
 0xcce   :  { %v1233_v35 = vsub.f32 1.0, %v1232_v32  ;;  %v1230_v43 = vadd.f32 1.0, %v2167_v46 }
 0xcd0   :  { %v1234_v62 = vmul.f32 %v2163_v27, %v1233_v35  ;;  %2168 = vrcp.f32 %v1230_v43  ;;  %v1257_v0 = vand.u32 2147483648, %v1230_v43  ;;  %vm1251_vm8 = vweird.f32 %v1230_v43 }
 0xcd1   :  { %v1255_v9 = vand.u32 2147483647, %v1230_v43 }
 0xcd2   :  { %v1235_v44 = vadd.f32 %v2163_v27, %v1234_v62  ;;  %v1258_v52 = vor.u32 1.1754944e-38, %v1257_v0 }
 0xcd3   :  { %vm1256_vm9 = vcmp.eq.f32.partialorder %v1255_v9, 8.507059e+37 }
 0xcd4   :  { %v1239_v5 = vsel %vm1238_vm5, %v2163_v27, %v1235_v44 }
 0xcd5   :  { %v1244_v16 = vsel %vm1241_vm6, %v1243_v4, %v1239_v5 }
 0xcd6   :  { %v1263_v42 = vmul.f32 %v2165_v14, %v1244_v16  ;;  %v2169_v48 = vpop.eup %2168  ;;  %v1262_v37 = vmul.f32 0.0, %v1244_v16 }
 0xcd7   :  { %v1247_v41 = vmul.f32 %v2169_v48, %v1230_v43  ;;  %vm1252_vm7 = vweird.f32 %v2169_v48 }
 0xcd8   :  { %1265 = vrot.lane.b32.xlu2 %v1263_v42, %s2259_s1  ;;  %vm1253_vm2 = vmor %vm1251_vm8, %vm1252_vm7 }
 0xcd9   :  { %v1248_v51 = vsub.f32 1.0, %v1247_v41 }
 0xcdb   :  { %v1249_v53 = vmul.f32 %v2169_v48, %v1248_v51 }
 0xcdd   :  { %v1250_v57 = vadd.f32 %v2169_v48, %v1249_v53 }
 0xcdf   :  { %v1254_v12 = vsel %vm1253_vm2, %v2169_v48, %v1250_v57 }
 0xce0   :  { %v1259_v40 = vsel %vm1256_vm9, %v1258_v52, %v1254_v12 }
 0xd32   :  { %v1266_v23 = vpop.permute.xlu2 %1265 }
 0xd33   :  { %v3072_v56 = vadd.f32 %v1266_v23, %v1262_v37 }
 0xd35   :  { %2170 = vtanh.f32 %v3072_v56 }
 0xd3b   :  { %v2171_v54 = vpop.eup %2170 }
 0xd3c   :  { %v1270_v58 = vmul.f32 %v2171_v54, %v1259_v40 }
 0xd3e   :  { %1272 = vrot.lane.b32.xlu0 %v1270_v58, %s2259_s1  ;;  %v1122_v58 = vpop.f32.mrf.mxu2 }
 0xdb0   :  { %v1273_v11 = vpop.permute.xlu0 %1272 }
 0xdb1   :  { %2016 = vmatmul.msk.f32.vlgmr.msra.gmra.mxu0 %vm316_vm15, %v1273_v11  ;;  %2017 = vmatmul.msk.f32.vlgmr.msra.gmra.mxu1 %vm316_vm15, %v1273_v11  ;;  %v1123_v11 = vadd.f32 %v1122_v58, %v3065_v26 }
 0xdb2   :  { %1474 = vmatpush.msra.mxu0 %v2853_v36  ;;  %1494 = vmatpush.msra.mxu1 %v2858_v39 }
 0xdb4   :  { %1475 = vmatpush.msra.mxu0 %v2863_v60  ;;  %1495 = vmatpush.msra.mxu1 %v2876_v1 }
 0xdb6   :  { %1476 = vmatpush.msra.mxu0 %v2881_v2  ;;  %1496 = vmatpush.msra.mxu1 %v2886_v3 }
 0xdb8   :  { %1477 = vmatpush.msra.mxu0 %v2901_v8  ;;  %1497 = vmatpush.msra.mxu1 %v2906_v7 }
 0xdba   :  { %1478 = vmatpush.msra.mxu0 %v2922_v17  ;;  %1498 = vmatpush.msra.mxu1 %v2927_v20 }
 0xdbc   :  { %1479 = vmatpush.msra.mxu0 %v2932_v22  ;;  %1499 = vmatpush.msra.mxu1 %v2939_v18 }
 0xdbe   :  { %1480 = vmatpush.msra.mxu0 %v2944_v24  ;;  %1500 = vmatpush.msra.mxu1 %v2949_v28 }
 0xdc0   :  { %1481 = vmatpush.msra.mxu0 %v2958_v29  ;;  %1501 = vmatpush.msra.mxu1 %v2963_v50 }
 0xe2e   :  { %v1293_v33 = vpop.f32.mrf.mxu0  ;;  %v1313_v21 = vpop.f32.mrf.mxu1 }
 0xe2f   :  { %v1316_v30 = vadd.f32 %v1293_v33, %v1120_v38  ;;  %v1317_v25 = vadd.f32 %v1313_v21, %v1161_v49 }
 0xe31   :  { %v2018_v15 = vmul.f32 -1.442695, %v1316_v30  ;;  %v2019_v16 = vmul.f32 -1.442695, %v1317_v25 }
 0xe33   :  { %2172 = vpow2.f32 %v2018_v15 }
 0xe39   :  { %v2173_v34 = vpop.eup %2172 }
 0xe3a   :  { %v1324_v55 = vadd.f32 1.0, %v2173_v34  ;;  %v1163_v34 = vpop.f32.mrf.mxu3 }
 0xe3b   :  { %v1164_v6 = vadd.f32 %v1163_v34, %v3068_v19 }
 0xe3c   :  { %2174 = vrcp.f32 %v1324_v55  ;;  %v1337_v32 = vand.u32 2147483648, %v1324_v55  ;;  %v1335_v61 = vand.u32 2147483647, %v1324_v55  ;;  %vm1331_vm11 = vweird.f32 %v1324_v55 }
 0xe3d   :  { %2176 = vtanh.f32 %v1317_v25 }
 0xe3e   :  { %v1338_v63 = vor.u32 1.1754944e-38, %v1337_v32  ;;  %vm1336_vm13 = vcmp.eq.f32.partialorder %v1335_v61, 8.507059e+37  ;;  %2178 = vpow2.f32 %v2019_v16 }
 0xe42   :  { %v2175_v59 = vpop.eup %2174 }
 0xe43   :  { %v1327_v27 = vmul.f32 %v2175_v59, %v1324_v55  ;;  %vm1332_vm10 = vweird.f32 %v2175_v59  ;;  %v2177_v4 = vpop.eup %2176 }
 0xe44   :  { %vm1333_vm12 = vmor %vm1331_vm11, %vm1332_vm10  ;;  %v2179_v42 = vpop.eup %2178 }
 0xe45   :  { %v1328_v31 = vsub.f32 1.0, %v1327_v27  ;;  %v1325_v45 = vadd.f32 1.0, %v2179_v42 }
 0xe47   :  { %v1329_v35 = vmul.f32 %v2175_v59, %v1328_v31  ;;  %2180 = vrcp.f32 %v1325_v45  ;;  %v1352_v57 = vand.u32 2147483648, %v1325_v45  ;;  %vm1346_vm0 = vweird.f32 %v1325_v45 }
 0xe48   :  { %v1350_v0 = vand.u32 2147483647, %v1325_v45 }
 0xe49   :  { %v1330_v62 = vadd.f32 %v2175_v59, %v1329_v35  ;;  %v1353_v12 = vor.u32 1.1754944e-38, %v1352_v57 }
 0xe4a   :  { %vm1351_vm3 = vcmp.eq.f32.partialorder %v1350_v0, 8.507059e+37 }
 0xe4b   :  { %v1334_v44 = vsel %vm1333_vm12, %v2175_v59, %v1330_v62 }
 0xe4c   :  { %v1339_v5 = vsel %vm1336_vm13, %v1338_v63, %v1334_v44 }
 0xe4d   :  { %v1358_v14 = vmul.f32 %v2177_v4, %v1339_v5  ;;  %v2181_v46 = vpop.eup %2180  ;;  %v1357_v51 = vmul.f32 %v1339_v5, %v3072_v56 }
 0xe4e   :  { %v1342_v43 = vmul.f32 %v2181_v46, %v1325_v45  ;;  %vm1347_vm14 = vweird.f32 %v2181_v46 }
 0xe4f   :  { %1360 = vrot.lane.b32.xlu1 %v1358_v14, %s2259_s1  ;;  %vm1348_vm1 = vmor %vm1346_vm0, %vm1347_vm14 }
 0xe50   :  { %v1343_v48 = vsub.f32 1.0, %v1342_v43 }
 0xe52   :  { %v1344_v41 = vmul.f32 %v2181_v46, %v1343_v48 }
 0xe54   :  { %v1345_v23 = vadd.f32 %v2181_v46, %v1344_v41 }
 0xe56   :  { %v1349_v9 = vsel %vm1348_vm1, %v2181_v46, %v1345_v23 }
 0xe57   :  { %v1354_v54 = vsel %vm1351_vm3, %v1353_v12, %v1349_v9 }
 0xec1   :  { %v1361_v53 = vpop.permute.xlu1 %1360 }
 0xec2   :  { %v3098_v37 = vadd.f32 %v1361_v53, %v1357_v51 }
 0xec4   :  { %2182 = vtanh.f32 %v3098_v37 }
 0xeca   :  { %v2183_v52 = vpop.eup %2182 }
 0xecb   :  { %v1365_v40 = vmul.f32 %v2183_v52, %v1354_v54 }
 0xecd   :  { %1367 = vrot.lane.b32.xlu2 %v1365_v40, %s2259_s1 }
 0xf27   :  { %v1368_v56 = vpop.permute.xlu2 %1367 }
 0xf28   :  { %2020 = vmatmul.msk.f32.vlgmr.msrb.gmra.mxu0 %vm316_vm15, %v1368_v56  ;;  %2021 = vmatmul.msk.f32.vlgmr.msrb.gmra.mxu1 %vm316_vm15, %v1368_v56 }
 0xf29   :  { %1569 = vmatpush.msrb.mxu0 %v2853_v36  ;;  %1589 = vmatpush.msrb.mxu1 %v2858_v39 }
 0xf2b   :  { %1570 = vmatpush.msrb.mxu0 %v2863_v60  ;;  %1590 = vmatpush.msrb.mxu1 %v2876_v1 }
 0xf2d   :  { %1571 = vmatpush.msrb.mxu0 %v2881_v2  ;;  %1591 = vmatpush.msrb.mxu1 %v2886_v3 }
 0xf2f   :  { %1572 = vmatpush.msrb.mxu0 %v2901_v8  ;;  %1592 = vmatpush.msrb.mxu1 %v2906_v7 }
 0xf31   :  { %1573 = vmatpush.msrb.mxu0 %v2922_v17  ;;  %1593 = vmatpush.msrb.mxu1 %v2927_v20 }
 0xf33   :  { %1574 = vmatpush.msrb.mxu0 %v2932_v22  ;;  %1594 = vmatpush.msrb.mxu1 %v2939_v18 }
 0xf35   :  { %1575 = vmatpush.msrb.mxu0 %v2944_v24  ;;  %1595 = vmatpush.msrb.mxu1 %v2949_v28 }
 0xf37   :  { %1576 = vmatpush.msrb.mxu0 %v2958_v29  ;;  %1596 = vmatpush.msrb.mxu1 %v2963_v50 }
 0xfa5   :  { %v1388_v13 = vpop.f32.mrf.mxu0  ;;  %v1408_v55 = vpop.f32.mrf.mxu1 }
 0xfa6   :  { %v1411_v38 = vadd.f32 %v1388_v13, %v1123_v11  ;;  %v1412_v49 = vadd.f32 %v1408_v55, %v1164_v6 }
 0xfa8   :  { %v2022_v33 = vmul.f32 -1.442695, %v1411_v38  ;;  %v2023_v5 = vmul.f32 -1.442695, %v1412_v49 }
 0xfaa   :  { %2184 = vpow2.f32 %v2022_v33 }
 0xfb0   :  { %v2185_v30 = vpop.eup %2184 }
 0xfb1   :  { %v1419_v15 = vadd.f32 1.0, %v2185_v30 }
 0xfb3   :  { %2186 = vrcp.f32 %v1419_v15  ;;  %v1432_v27 = vand.u32 2147483648, %v1419_v15  ;;  %v1430_v32 = vand.u32 2147483647, %v1419_v15  ;;  %vm1426_vm5 = vweird.f32 %v1419_v15 }
 0xfb4   :  { %2188 = vtanh.f32 %v1412_v49 }
 0xfb5   :  { %v1433_v61 = vor.u32 1.1754944e-38, %v1432_v27  ;;  %vm1431_vm7 = vcmp.eq.f32.partialorder %v1430_v32, 8.507059e+37  ;;  %2190 = vpow2.f32 %v2023_v5 }
 0xfb9   :  { %v2187_v21 = vpop.eup %2186 }
 0xfba   :  { %v1422_v59 = vmul.f32 %v2187_v21, %v1419_v15  ;;  %vm1427_vm4 = vweird.f32 %v2187_v21  ;;  %v2189_v63 = vpop.eup %2188 }
 0xfbb   :  { %vm1428_vm6 = vmor %vm1426_vm5, %vm1427_vm4  ;;  %v2191_v14 = vpop.eup %2190 }
 0xfbc   :  { %v1423_v25 = vsub.f32 1.0, %v1422_v59  ;;  %v1420_v16 = vadd.f32 1.0, %v2191_v14 }
 0xfbe   :  { %v1424_v31 = vmul.f32 %v2187_v21, %v1423_v25  ;;  %2192 = vrcp.f32 %v1420_v16  ;;  %v1447_v23 = vand.u32 2147483648, %v1420_v16  ;;  %vm1441_vm2 = vweird.f32 %v1420_v16 }
 0xfbf   :  { %v1445_v57 = vand.u32 2147483647, %v1420_v16 }
 0xfc0   :  { %v1425_v35 = vadd.f32 %v2187_v21, %v1424_v31  ;;  %v1448_v9 = vor.u32 1.1754944e-38, %v1447_v23 }
 0xfc1   :  { %vm1446_vm10 = vcmp.eq.f32.partialorder %v1445_v57, 8.507059e+37 }
 0xfc2   :  { %v1429_v62 = vsel %vm1428_vm6, %v2187_v21, %v1425_v35 }
 0xfc3   :  { %v1434_v44 = vsel %vm1431_vm7, %v1433_v61, %v1429_v62 }
 0xfc4   :  { %v1453_v4 = vmul.f32 %v2189_v63, %v1434_v44  ;;  %v2193_v42 = vpop.eup %2192  ;;  %v1452_v48 = vmul.f32 %v1434_v44, %v3098_v37 }
 0xfc5   :  { %v1437_v45 = vmul.f32 %v2193_v42, %v1420_v16  ;;  %vm1442_vm8 = vweird.f32 %v2193_v42 }
 0xfc6   :  { %1455 = vrot.lane.b32.xlu0 %v1453_v4, %s2259_s1  ;;  %vm1443_vm9 = vmor %vm1441_vm2, %vm1442_vm8 }
 0xfc7   :  { %v1438_v46 = vsub.f32 1.0, %v1437_v45 }
 0xfc9   :  { %v1439_v43 = vmul.f32 %v2193_v42, %v1438_v46 }
 0xfcb   :  { %v1440_v53 = vadd.f32 %v2193_v42, %v1439_v43 }
 0xfcd   :  { %v1444_v0 = vsel %vm1443_vm9, %v2193_v42, %v1440_v53 }
 0xfce   :  { %v1449_v52 = vsel %vm1446_vm10, %v1448_v9, %v1444_v0 }
0x1038   :  { %v1456_v41 = vpop.permute.xlu0 %1455 }
0x1039   :  { %v3124_v51 = vadd.f32 %v1456_v41, %v1452_v48 }
0x103b   :  { %2194 = vtanh.f32 %v3124_v51 }
0x1041   :  { %v2195_v12 = vpop.eup %2194 }
0x1042   :  { %v1460_v54 = vmul.f32 %v2195_v12, %v1449_v52 }
0x1044   :  { %1462 = vrot.lane.b32.xlu1 %v1460_v54, %s2259_s1 }
0x10b6   :  { %v1463_v37 = vpop.permute.xlu1 %1462 }
0x10b7   :  { %2024 = vmatmul.msk.f32.vlgmr.msra.gmra.mxu0 %vm316_vm15, %v1463_v37  ;;  %2025 = vmatmul.msk.f32.vlgmr.msra.gmra.mxu1 %vm316_vm15, %v1463_v37 }
0x10b8   :  { %1759 = vmatpush.msra.mxu0 %v2853_v36  ;;  %1779 = vmatpush.msra.mxu1 %v2858_v39  ;;  %v1125_v36 = vpop.f32.mrf.mxu2 }
0x10b9   :  { %v1126_v39 = vadd.f32 %v1125_v36, %v3065_v26 }
0x10ba   :  { %1760 = vmatpush.msra.mxu0 %v2863_v60  ;;  %1780 = vmatpush.msra.mxu1 %v2876_v1 }
0x10bc   :  { %1761 = vmatpush.msra.mxu0 %v2881_v2  ;;  %1781 = vmatpush.msra.mxu1 %v2886_v3 }
0x10be   :  { %1762 = vmatpush.msra.mxu0 %v2901_v8  ;;  %1782 = vmatpush.msra.mxu1 %v2906_v7  ;;  %v1166_v7 = vpop.f32.mrf.mxu3 }
0x10c0   :  { %1763 = vmatpush.msra.mxu0 %v2922_v17  ;;  %1783 = vmatpush.msra.mxu1 %v2927_v20  ;;  %v1167_v20 = vadd.f32 %v1166_v7, %v3068_v19  ;;  %v1128_v16 = vpop.f32.mrf.mxu2 }
0x10c1   :  { %v1129_v42 = vadd.f32 %v1128_v16, %v3065_v26 }
0x10c2   :  { %1764 = vmatpush.msra.mxu0 %v2932_v22  ;;  %1784 = vmatpush.msra.mxu1 %v2939_v18 }
0x10c4   :  { %1765 = vmatpush.msra.mxu0 %v2944_v24  ;;  %1785 = vmatpush.msra.mxu1 %v2949_v28 }
0x10c6   :  { %1766 = vmatpush.msra.mxu0 %v2958_v29  ;;  %1786 = vmatpush.msra.mxu1 %v2963_v50  ;;  %v1169_v41 = vpop.f32.mrf.mxu3 }
0x10c7   :  { %v1170_v53 = vadd.f32 %v1169_v41, %v3068_v19 }
0x1134   :  { %v1483_v60 = vpop.f32.mrf.mxu0  ;;  %v1503_v17 = vpop.f32.mrf.mxu1 }
0x1135   :  { %v1506_v1 = vadd.f32 %v1483_v60, %v1126_v39  ;;  %v1507_v18 = vadd.f32 %v1503_v17, %v1167_v20 }
0x1137   :  { %v2026_v2 = vmul.f32 -1.442695, %v1506_v1  ;;  %v2027_v30 = vmul.f32 -1.442695, %v1507_v18 }
0x1139   :  { %2196 = vpow2.f32 %v2026_v2 }
0x113f   :  { %v2197_v3 = vpop.eup %2196 }
0x1140   :  { %v1514_v8 = vadd.f32 1.0, %v2197_v3 }
0x1142   :  { %2198 = vrcp.f32 %v1514_v8  ;;  %v1527_v29 = vand.u32 2147483648, %v1514_v8  ;;  %v1525_v40 = vand.u32 2147483647, %v1514_v8  ;;  %vm1521_vm12 = vweird.f32 %v1514_v8 }
0x1143   :  { %2200 = vtanh.f32 %v1507_v18 }
0x1144   :  { %v1528_v58 = vor.u32 1.1754944e-38, %v1527_v29  ;;  %vm1526_vm14 = vcmp.eq.f32.partialorder %v1525_v40, 8.507059e+37  ;;  %2202 = vpow2.f32 %v2027_v30 }
0x1148   :  { %v2199_v22 = vpop.eup %2198 }
0x1149   :  { %v1517_v24 = vmul.f32 %v2199_v22, %v1514_v8  ;;  %vm1522_vm11 = vweird.f32 %v2199_v22  ;;  %v2201_v13 = vpop.eup %2200 }
0x114a   :  { %vm1523_vm13 = vmor %vm1521_vm12, %vm1522_vm11  ;;  %v2203_v15 = vpop.eup %2202 }
0x114b   :  { %v1518_v28 = vsub.f32 1.0, %v1517_v24  ;;  %v1515_v34 = vadd.f32 1.0, %v2203_v15  ;;  %v1131_v15 = vpop.f32.mrf.mxu2 }
0x114d   :  { %v1519_v50 = vmul.f32 %v2199_v22, %v1518_v28  ;;  %2204 = vrcp.f32 %v1515_v34  ;;  %v1542_v32 = vand.u32 2147483648, %v1515_v34  ;;  %vm1536_vm1 = vweird.f32 %v1515_v34 }
0x114e   :  { %v1540_v35 = vand.u32 2147483647, %v1515_v34 }
0x114f   :  { %v1520_v56 = vadd.f32 %v2199_v22, %v1519_v50  ;;  %v1543_v61 = vor.u32 1.1754944e-38, %v1542_v32 }
0x1150   :  { %vm1541_vm4 = vcmp.eq.f32.partialorder %v1540_v35, 8.507059e+37 }
0x1151   :  { %v1524_v11 = vsel %vm1523_vm13, %v2199_v22, %v1520_v56 }
0x1152   :  { %v1529_v38 = vsel %vm1526_vm14, %v1528_v58, %v1524_v11 }
0x1153   :  { %v1548_v33 = vmul.f32 %v2201_v13, %v1529_v38  ;;  %v2205_v55 = vpop.eup %2204  ;;  %v1547_v59 = vmul.f32 %v1529_v38, %v3124_v51 }
0x1154   :  { %v1532_v6 = vmul.f32 %v2205_v55, %v1515_v34  ;;  %vm1537_vm0 = vweird.f32 %v2205_v55  ;;  %v3163_v34 = vpop.f32.mrf.mxu2 }
0x1155   :  { %1550 = vrot.lane.b32.xlu2 %v1548_v33, %s2259_s1  ;;  %vm1538_vm3 = vmor %vm1536_vm1, %vm1537_vm0 }
0x1156   :  { %v1533_v21 = vsub.f32 1.0, %v1532_v6 }
0x1158   :  { %v1534_v49 = vmul.f32 %v2205_v55, %v1533_v21  ;;  %v1132_v21 = vadd.f32 %v1131_v15, %v3065_v26 }
0x115a   :  { %v1535_v31 = vadd.f32 %v2205_v55, %v1534_v49 }
0x115d   :  { %1090 = vrot.lane.b32.xlu2 %v3013_v10, %s2259_s1  ;;  %v1539_v10 = vsel %vm1538_vm3, %v2205_v55, %v1535_v31  ;;  %v1172_v55 = vpop.f32.mrf.mxu3 }
0x115e   :  { %v1544_v4 = vsel %vm1541_vm4, %v1543_v61, %v1539_v10  ;;  %v1173_v61 = vadd.f32 %v1172_v55, %v3068_v19 }
0x11af   :  { %v1551_v25 = vpop.permute.xlu2 %1550 }
0x11b0   :  { %v1553_v27 = vadd.f32 %v1551_v25, %v1547_v59  ;;  %v3168_v59 = vpop.f32.mrf.mxu3 }
0x11b2   :  { %2206 = vtanh.f32 %v1553_v27 }
0x11b7   :  { %v1091_v62 = vpop.permute.xlu2 %1090 }
0x11b8   :  { %v2207_v63 = vpop.eup %2206  ;;  %v1093_v44 = vsel %vm316_vm15, %v1091_v62, %v2555_v47 }
0x11b9   :  { %1136 = vmatmul.f32.gmra.mxu2 %v1093_v44  ;;  %1177 = vmatmul.f32.gmra.mxu3 %v1093_v44  ;;  %v1555_v5 = vmul.f32 %v2207_v63, %v1544_v4 }
0x11bb   :  { %1557 = vrot.lane.b32.xlu0 %v1555_v5, %s2259_s1 }
0x122d   :  { %v1558_v14 = vpop.permute.xlu0 %1557 }
0x122e   :  { %2028 = vmatmul.msk.f32.vlgmr.msrb.gmra.mxu0 %vm316_vm15, %v1558_v14  ;;  %2029 = vmatmul.msk.f32.vlgmr.msrb.gmra.mxu1 %vm316_vm15, %v1558_v14 }
0x123c   :  { %v3165_v6 = vpop.f32.mrf.mxu2  ;;  %v3170_v31 = vpop.f32.mrf.mxu3 }
0x12ab   :  { %v1578_v45 = vpop.f32.mrf.mxu0  ;;  %v1598_v51 = vpop.f32.mrf.mxu1 }
0x12ac   :  { %v1601_v46 = vadd.f32 %v1578_v45, %v1129_v42  ;;  %v1602_v57 = vadd.f32 %v1598_v51, %v1170_v53 }
0x12ae   :  { %v2030_v43 = vmul.f32 -1.442695, %v1601_v46  ;;  %v2031_v3 = vmul.f32 -1.442695, %v1602_v57 }
0x12b0   :  { %2208 = vpow2.f32 %v2030_v43 }
0x12b6   :  { %v2209_v48 = vpop.eup %2208 }
0x12b7   :  { %v1609_v47 = vadd.f32 1.0, %v2209_v48 }
0x12b9   :  { %2210 = vrcp.f32 %v1609_v47  ;;  %v1622_v12 = vand.u32 2147483648, %v1609_v47  ;;  %v1620_v54 = vand.u32 2147483647, %v1609_v47  ;;  %vm1616_vm6 = vweird.f32 %v1609_v47 }
0x12ba   :  { %2212 = vtanh.f32 %v1602_v57 }
0x12bb   :  { %v1623_v36 = vor.u32 1.1754944e-38, %v1622_v12  ;;  %vm1621_vm8 = vcmp.eq.f32.partialorder %v1620_v54, 8.507059e+37  ;;  %2214 = vpow2.f32 %v2031_v3 }
0x12bf   :  { %v2211_v23 = vpop.eup %2210 }
0x12c0   :  { %v1612_v0 = vmul.f32 %v2211_v23, %v1609_v47  ;;  %vm1617_vm5 = vweird.f32 %v2211_v23  ;;  %v2213_v60 = vpop.eup %2212 }
0x12c1   :  { %vm1618_vm7 = vmor %vm1616_vm6, %vm1617_vm5  ;;  %v2215_v8 = vpop.eup %2214 }
0x12c2   :  { %v1613_v9 = vsub.f32 1.0, %v1612_v0  ;;  %v1610_v7 = vadd.f32 1.0, %v2215_v8 }
0x12c4   :  { %v1614_v52 = vmul.f32 %v2211_v23, %v1613_v9  ;;  %2216 = vrcp.f32 %v1610_v7  ;;  %v1637_v40 = vand.u32 2147483648, %v1610_v7  ;;  %vm1631_vm9 = vweird.f32 %v1610_v7 }
0x12c5   :  { %v1635_v56 = vand.u32 2147483647, %v1610_v7 }
0x12c6   :  { %v1615_v37 = vadd.f32 %v2211_v23, %v1614_v52  ;;  %v1638_v11 = vor.u32 1.1754944e-38, %v1637_v40 }
0x12c7   :  { %vm1636_vm11 = vcmp.eq.f32.partialorder %v1635_v56, 8.507059e+37 }
0x12c8   :  { %v1619_v39 = vsel %vm1618_vm7, %v2211_v23, %v1615_v37 }
0x12c9   :  { %v1624_v1 = vsel %vm1621_vm8, %v1623_v36, %v1619_v39 }
0x12ca   :  { %v1643_v2 = vmul.f32 %v2213_v60, %v1624_v1  ;;  %v2217_v17 = vpop.eup %2216  ;;  %v1642_v24 = vmul.f32 %v1624_v1, %v1553_v27 }
0x12cb   :  { %v1627_v20 = vmul.f32 %v2217_v17, %v1610_v7  ;;  %vm1632_vm2 = vweird.f32 %v2217_v17 }
0x12cc   :  { %1645 = vrot.lane.b32.xlu1 %v1643_v2, %s2259_s1  ;;  %vm1633_vm10 = vmor %vm1631_vm9, %vm1632_vm2 }
0x12cd   :  { %v1628_v22 = vsub.f32 1.0, %v1627_v20 }
0x12cf   :  { %v1629_v18 = vmul.f32 %v2217_v17, %v1628_v22 }
0x12d1   :  { %v1630_v50 = vadd.f32 %v2217_v17, %v1629_v18 }
0x12d3   :  { %v1634_v58 = vsel %vm1633_vm10, %v2217_v17, %v1630_v50  ;;  %v1135_v17 = vadd.f32 %v3163_v34, %v3065_v26  ;;  %v1176_v50 = vadd.f32 %v3168_v59, %v3068_v19 }
0x12d4   :  { %v1639_v38 = vsel %vm1636_vm11, %v1638_v11, %v1634_v58 }
0x133e   :  { %v1646_v28 = vpop.permute.xlu1 %1645 }
0x133f   :  { %v1648_v29 = vadd.f32 %v1646_v28, %v1642_v24 }
0x1341   :  { %2218 = vtanh.f32 %v1648_v29 }
0x1347   :  { %v2219_v13 = vpop.eup %2218 }
0x1348   :  { %v1650_v33 = vmul.f32 %v2219_v13, %v1639_v38 }
0x134a   :  { %1652 = vrot.lane.b32.xlu0 %v1650_v33, %s2259_s1 }
0x13bc   :  { %v1653_v30 = vpop.permute.xlu0 %1652 }
0x13bd   :  { %2032 = vmatmul.msk.f32.vlgmr.msrb.gmra.mxu2 %vm316_vm15, %v1653_v30  ;;  %2033 = vmatmul.msk.f32.vlgmr.msrb.gmra.mxu3 %vm316_vm15, %v1653_v30 }
0x1440   :  { %v1673_v49 = vpop.f32.mrf.mxu2  ;;  %v1693_v10 = vpop.f32.mrf.mxu3 }
0x1441   :  { %v1696_v25 = vadd.f32 %v1673_v49, %v1132_v21  ;;  %v1697_v63 = vadd.f32 %v1693_v10, %v1173_v61 }
0x1443   :  { %v2034_v27 = vmul.f32 -1.442695, %v1696_v25  ;;  %v2035_v41 = vmul.f32 -1.442695, %v1697_v63 }
0x1445   :  { %2220 = vpow2.f32 %v2034_v27 }
0x144b   :  { %v2221_v32 = vpop.eup %2220 }
0x144c   :  { %v1704_v35 = vadd.f32 1.0, %v2221_v32 }
0x144e   :  { %2222 = vrcp.f32 %v1704_v35  ;;  %v1717_v5 = vand.u32 2147483648, %v1704_v35  ;;  %v1715_v16 = vand.u32 2147483647, %v1704_v35  ;;  %vm1711_vm13 = vweird.f32 %v1704_v35 }
0x144f   :  { %2224 = vtanh.f32 %v1697_v63 }
0x1450   :  { %v1718_v45 = vor.u32 1.1754944e-38, %v1717_v5  ;;  %vm1716_vm0 = vcmp.eq.f32.partialorder %v1715_v16, 8.507059e+37  ;;  %2226 = vpow2.f32 %v2035_v41  ;;  %v1138_v41 = vadd.f32 %v3165_v6, %v3065_v26 }
0x1454   :  { %v2223_v62 = vpop.eup %2222 }
0x1455   :  { %v1707_v44 = vmul.f32 %v2223_v62, %v1704_v35  ;;  %vm1712_vm12 = vweird.f32 %v2223_v62  ;;  %v2225_v43 = vpop.eup %2224 }
0x1456   :  { %vm1713_vm14 = vmor %vm1711_vm13, %vm1712_vm12  ;;  %v2227_v51 = vpop.eup %2226 }
0x1457   :  { %v1708_v4 = vsub.f32 1.0, %v1707_v44  ;;  %v1705_v53 = vadd.f32 1.0, %v2227_v51 }
0x1459   :  { %v1709_v14 = vmul.f32 %v2223_v62, %v1708_v4  ;;  %2228 = vrcp.f32 %v1705_v53  ;;  %v1732_v36 = vand.u32 2147483648, %v1705_v53  ;;  %vm1726_vm3 = vweird.f32 %v1705_v53 }
0x145a   :  { %v1730_v39 = vand.u32 2147483647, %v1705_v53 }
0x145b   :  { %v1710_v42 = vadd.f32 %v2223_v62, %v1709_v14  ;;  %v1733_v1 = vor.u32 1.1754944e-38, %v1732_v36 }
0x145c   :  { %vm1731_vm5 = vcmp.eq.f32.partialorder %v1730_v39, 8.507059e+37 }
0x145d   :  { %v1714_v46 = vsel %vm1713_vm14, %v2223_v62, %v1710_v42 }
0x145e   :  { %v1719_v48 = vsel %vm1716_vm0, %v1718_v45, %v1714_v46 }
0x145f   :  { %v1738_v47 = vmul.f32 %v2225_v43, %v1719_v48  ;;  %v2229_v23 = vpop.eup %2228  ;;  %v1737_v12 = vmul.f32 %v1719_v48, %v1648_v29 }
0x1460   :  { %v1722_v57 = vmul.f32 %v2229_v23, %v1705_v53  ;;  %vm1727_vm1 = vweird.f32 %v2229_v23 }
0x1461   :  { %1740 = vrot.lane.b32.xlu1 %v1738_v47, %s2259_s1  ;;  %vm1728_vm4 = vmor %vm1726_vm3, %vm1727_vm1  ;;  %v2062_v47 = vld [vmem:[%s3205_s3] ss:$0 sm:$0xff] }
0x1462   :  { %v1723_v0 = vsub.f32 1.0, %v1722_v57 }
0x1464   :  { %v1724_v9 = vmul.f32 %v2229_v23, %v1723_v0 }
0x1466   :  { %v1725_v37 = vadd.f32 %v2229_v23, %v1724_v9 }
0x1468   :  { %v1729_v60 = vsel %vm1728_vm4, %v2229_v23, %v1725_v37 }
0x1469   :  { %v1734_v3 = vsel %vm1731_vm5, %v1733_v1, %v1729_v60 }
0x14d3   :  { %v1741_v52 = vpop.permute.xlu1 %1740 }
0x14d4   :  { %v1743_v54 = vadd.f32 %v1741_v52, %v1737_v12  ;;  %v1179_v12 = vadd.f32 %v3170_v31, %v3068_v19 }
0x14d6   :  { %2230 = vtanh.f32 %v1743_v54 }
0x14dc   :  { %v2231_v2 = vpop.eup %2230 }
0x14dd   :  { %v1745_v8 = vmul.f32 %v2231_v2, %v1734_v3 }
0x14df   :  { %1747 = vrot.lane.b32.xlu2 %v1745_v8, %s2259_s1 }
0x1539   :  { %v1748_v7 = vpop.permute.xlu2 %1747 }
0x153a   :  { %2036 = vmatmul.msk.f32.vlgmr.msra.gmra.mxu0 %vm316_vm15, %v1748_v7  ;;  %2037 = vmatmul.msk.f32.vlgmr.msra.gmra.mxu1 %vm316_vm15, %v1748_v7 }
0x15b7   :  { %v1768_v20 = vpop.f32.mrf.mxu0  ;;  %v1788_v29 = vpop.f32.mrf.mxu1 }
0x15b8   :  { %v1791_v22 = vadd.f32 %v1768_v20, %v1135_v17  ;;  %v1792_v56 = vadd.f32 %v1788_v29, %v1176_v50 }
0x15ba   :  { %v2038_v18 = vmul.f32 -1.442695, %v1791_v22  ;;  %v2039_v59 = vmul.f32 -1.442695, %v1792_v56 }
0x15bc   :  { %2232 = vpow2.f32 %v2038_v18 }
0x15c2   :  { %v2233_v24 = vpop.eup %2232 }
0x15c3   :  { %v1799_v28 = vadd.f32 1.0, %v2233_v24 }
0x15c5   :  { %2234 = vrcp.f32 %v1799_v28  ;;  %v1812_v13 = vand.u32 2147483648, %v1799_v28  ;;  %v1810_v33 = vand.u32 2147483647, %v1799_v28  ;;  %vm1806_vm7 = vweird.f32 %v1799_v28 }
0x15c6   :  { %2236 = vtanh.f32 %v1792_v56 }
0x15c7   :  { %v1813_v15 = vor.u32 1.1754944e-38, %v1812_v13  ;;  %vm1811_vm2 = vcmp.eq.f32.partialorder %v1810_v33, 8.507059e+37  ;;  %2238 = vpow2.f32 %v2039_v59 }
0x15cb   :  { %v2235_v40 = vpop.eup %2234 }
0x15cc   :  { %v1802_v58 = vmul.f32 %v2235_v40, %v1799_v28  ;;  %vm1807_vm6 = vweird.f32 %v2235_v40  ;;  %v2237_v55 = vpop.eup %2236 }
0x15cd   :  { %vm1808_vm8 = vmor %vm1806_vm7, %vm1807_vm6  ;;  %v2239_v25 = vpop.eup %2238  ;;  %vm1953_vm7 = vcmask 7168  }
0x15ce   :  { %v1803_v11 = vsub.f32 1.0, %v1802_v58  ;;  %v1800_v27 = vadd.f32 1.0, %v2239_v25 }
0x15d0   :  { %v1804_v38 = vmul.f32 %v2235_v40, %v1803_v11  ;;  %2240 = vrcp.f32 %v1800_v27  ;;  %v1827_v5 = vand.u32 2147483648, %v1800_v27  ;;  %vm1821_vm10 = vweird.f32 %v1800_v27 }
0x15d1   :  { %v1825_v14 = vand.u32 2147483647, %v1800_v27 }
0x15d2   :  { %v1805_v30 = vadd.f32 %v2235_v40, %v1804_v38  ;;  %v1828_v42 = vor.u32 1.1754944e-38, %v1827_v5 }
0x15d3   :  { %vm1826_vm12 = vcmp.eq.f32.partialorder %v1825_v14, 8.507059e+37 }
0x15d4   :  { %v1809_v34 = vsel %vm1808_vm8, %v2235_v40, %v1805_v30 }
0x15d5   :  { %v1814_v21 = vsel %vm1811_vm2, %v1813_v15, %v1809_v34 }
0x15d6   :  { %v1833_v49 = vmul.f32 %v2237_v55, %v1814_v21  ;;  %v2241_v32 = vpop.eup %2240  ;;  %v1832_v62 = vmul.f32 %v1814_v21, %v1743_v54 }
0x15d7   :  { %v1817_v35 = vmul.f32 %v2241_v32, %v1800_v27  ;;  %vm1822_vm9 = vweird.f32 %v2241_v32 }
0x15d8   :  { %1835 = vrot.lane.b32.xlu0 %v1833_v49, %s2259_s1  ;;  %vm1823_vm11 = vmor %vm1821_vm10, %vm1822_vm9  ;;  %v2063_v49 = vld [vmem:[%s3205_s3 + $0x1] ss:$0 sm:$0xff] }
0x15d9   :  { %v1818_v10 = vsub.f32 1.0, %v1817_v35 }
0x15db   :  { %v1819_v61 = vmul.f32 %v2241_v32, %v1818_v10 }
0x15dd   :  { %v1820_v4 = vadd.f32 %v2241_v32, %v1819_v61 }
0x15df   :  { %v1824_v16 = vsel %vm1823_vm11, %v2241_v32, %v1820_v4 }
0x15e0   :  { %v1829_v46 = vsel %vm1826_vm12, %v1828_v42, %v1824_v16  ;;  %1939 = vrot.lane.b32.xlu0 %v2062_v47, %s2259_s1 }
0x164a   :  { %v1836_v63 = vpop.permute.xlu0 %1835 }
0x164b   :  { %v1838_v44 = vadd.f32 %v1836_v63, %v1832_v62 }
0x164d   :  { %2242 = vtanh.f32 %v1838_v44 }
0x1652   :  { %v1940_v33 = vpop.permute.xlu0 %1939 }
0x1653   :  { %v2243_v45 = vpop.eup %2242 }
0x1654   :  { %v1840_v43 = vmul.f32 %v2243_v45, %v1829_v46 }
0x1656   :  { %1842 = vrot.lane.b32.xlu1 %v1840_v43, %s2259_s1 }
0x16c8   :  { %v1843_v48 = vpop.permute.xlu1 %1842 }
0x16c9   :  { %2040 = vmatmul.msk.f32.vlgmr.msra.gmra.mxu2 %vm316_vm15, %v1843_v48  ;;  %2041 = vmatmul.msk.f32.vlgmr.msra.gmra.mxu3 %vm316_vm15, %v1843_v48 }
0x174c   :  { %v1863_v51 = vpop.f32.mrf.mxu2  ;;  %v1883_v9 = vpop.f32.mrf.mxu3 }
0x174d   :  { %v1886_v53 = vadd.f32 %v1863_v51, %v1138_v41  ;;  %v1887_v54 = vadd.f32 %v1883_v9, %v1179_v12 }
0x174f   :  { %v2042_v23 = vmul.f32 -1.442695, %v1886_v53  ;;  %v2043_v19 = vmul.f32 -1.442695, %v1887_v54 }
0x1751   :  { %2244 = vpow2.f32 %v2042_v23 }
0x1757   :  { %v2245_v57 = vpop.eup %2244 }
0x1758   :  { %v1894_v0 = vadd.f32 1.0, %v2245_v57 }
0x175a   :  { %2246 = vrcp.f32 %v1894_v0  ;;  %v1907_v39 = vand.u32 2147483648, %v1894_v0  ;;  %v1905_v26 = vand.u32 2147483647, %v1894_v0  ;;  %vm1901_vm14 = vweird.f32 %v1894_v0 }
0x175b   :  { %2248 = vtanh.f32 %v1887_v54 }
0x175c   :  { %v1908_v1 = vor.u32 1.1754944e-38, %v1907_v39  ;;  %vm1906_vm1 = vcmp.eq.f32.partialorder %v1905_v26, 8.507059e+37  ;;  %2250 = vpow2.f32 %v2043_v19 }
0x1760   :  { %v2247_v52 = vpop.eup %2246 }
0x1761   :  { %v1897_v37 = vmul.f32 %v2247_v52, %v1894_v0  ;;  %vm1902_vm13 = vweird.f32 %v2247_v52  ;;  %v2249_v3 = vpop.eup %2248 }
0x1762   :  { %vm1903_vm0 = vmor %vm1901_vm14, %vm1902_vm13  ;;  %v2251_v31 = vpop.eup %2250 }
0x1763   :  { %v1898_v36 = vsub.f32 1.0, %v1897_v37  ;;  %v1895_v17 = vadd.f32 1.0, %v2251_v31 }
0x1765   :  { %v1899_v60 = vmul.f32 %v2247_v52, %v1898_v36  ;;  %2252 = vrcp.f32 %v1895_v17  ;;  %v1922_v56 = vand.u32 2147483648, %v1895_v17  ;;  %vm1916_vm4 = vweird.f32 %v1895_v17 }
0x1766   :  { %v1920_v58 = vand.u32 2147483647, %v1895_v17 }
0x1767   :  { %v1900_v6 = vadd.f32 %v2247_v52, %v1899_v60  ;;  %v1923_v13 = vor.u32 1.1754944e-38, %v1922_v56 }
0x1768   :  { %vm1921_vm6 = vcmp.eq.f32.partialorder %v1920_v58, 8.507059e+37 }
0x1769   :  { %v1904_v2 = vsel %vm1903_vm0, %v2247_v52, %v1900_v6 }
0x176a   :  { %v1909_v8 = vsel %vm1906_vm1, %v1908_v1, %v1904_v2 }
0x176b   :  { %v1928_v7 = vmul.f32 %v2249_v3, %v1909_v8  ;;  %v2253_v20 = vpop.eup %2252  ;;  %v1927_v28 = vmul.f32 %v1909_v8, %v1838_v44 }
0x176c   :  { %v1912_v22 = vmul.f32 %v2253_v20, %v1895_v17  ;;  %vm1917_vm3 = vweird.f32 %v2253_v20 }
0x176d   :  { %1930 = vrot.lane.b32.xlu2 %v1928_v7, %s2259_s1  ;;  %vm1918_vm5 = vmor %vm1916_vm4, %vm1917_vm3 }
0x176e   :  { %v1913_v18 = vsub.f32 1.0, %v1912_v22 }
0x1770   :  { %v1914_v24 = vmul.f32 %v2253_v20, %v1913_v18 }
0x1772   :  { %v1915_v40 = vadd.f32 %v2253_v20, %v1914_v24 }
0x1774   :  { %v1919_v11 = vsel %vm1918_vm5, %v2253_v20, %v1915_v40 }
0x1775   :  { %v1924_v30 = vsel %vm1921_vm6, %v1923_v13, %v1919_v11 }
0x17c7   :  { %v1931_v29 = vpop.permute.xlu2 %1930 }
0x17c8   :  { %v1933_v50 = vadd.f32 %v1931_v29, %v1927_v28 }
0x17ca   :  { %2254 = vtanh.f32 %v1933_v50 }
0x17d0   :  { %v2255_v38 = vpop.eup %2254 }
0x17d1   :  { %v1935_v15 = vmul.f32 %v2255_v38, %v1924_v30 }
0x17d3   :  { %v1942_v34 = vmul.f32 %v1940_v33, %v1935_v15 }
0x17d5   :  { %1944 = vrot.lane.b32.xlu1 %v1942_v34, %s2259_s1 }
0x1847   :  { %v1945_v55 = vpop.permute.xlu1 %1944 }
0x1848   :  { %v1947_v21 = vsel %vm316_vm15, %v1945_v55, 0.0 }
0x1849   :  { %1948 = vadd.xlane.f32.xlu2 %v1947_v21 }
0x18bc   :  { %v1949_v59 = vpop.xlane.xlu2 %1948 }
0x18bd   :  { %v1952_v25 = vadd.f32 %v2063_v49, %v1949_v59 }
0x18bf   :  { %1954 = vst.msk [vmem:[%s3206_s4] sm:$0xff] %vm1953_vm7, %v1952_v25 }

</bundles_post_ra>
